<compile_context>
chip_gen: v7x
topology: tpu7x:2x2x1
jax: 0.10.0
libtpu: 0.0.40
codegen_flags: <defaults>
</compile_context>

<pallas_src>
import functools

import jax
import jax.numpy as jnp
from jax import lax
from jax.experimental import pallas as pl
from jax.experimental.pallas import tpu as pltpu


# ----------------------------- Pallas kernel --------------------------------
def model4_kernel(
    x_ref,              # (TB*T, D)  batch-major flat: row = b*T + t
    wi3_ref, bi3_ref,   # fused input-gate weights  [r|z|n]: (D, 3D), (1, 3D)
    wh3_ref, bh3_ref,   # fused hidden-gate weights [r|z|n]: (D, 3D), (1, 3D)
    wq_ref, bq_ref,     # q linear  (D, D), (1, D)
    wv_ref, bv_ref,     # v linear  (D, D), (1, D)
    w1_ref, b1_ref,     # MLP layer (D, H), (1, H)
    w2t_ref, b2_ref,    # MLP head  (1, H), (1, 1)   (w2 pre-transposed)
    out_ref,            # (TB, 1)
    hs_ref,             # scratch: (TB, T, D) GRU outputs
    *, seq_len,
):
    T = seq_len
    BT, D = x_ref.shape
    TB = BT // T
    f32 = jnp.float32

    def dot(a, b):
        return jnp.dot(a, b, preferred_element_type=f32)

    # Hoisted weight/bias loads (the recurrence is fully unrolled below; load once).
    wi3 = wi3_ref[...]
    bi3 = bi3_ref[...]
    wh3 = wh3_ref[...]
    bh3 = bh3_ref[...]

    # ---- GRU: all input-side gate projections in a single batched matmul -----
    gx_all = dot(x_ref[...], wi3) + bi3                  # (TB*T, 3D)
    gx_all = gx_all.reshape(TB, T, 3 * D)                # tile-aligned (T == 8)

    # ---- recurrence (PyTorch gate equations, h0 = 0), fully unrolled ---------
    h = jnp.zeros((TB, D), f32)
    for t in range(T):                                   # static indices everywhere
        gx = gx_all[:, t, :]                             # (TB, 3D)
        gh = dot(h, wh3) + bh3                           # (TB, 3D)  one MXU call/step
        r = jax.nn.sigmoid(gx[:, :D] + gh[:, :D])
        z = jax.nn.sigmoid(gx[:, D:2 * D] + gh[:, D:2 * D])
        n = jnp.tanh(gx[:, 2 * D:] + r * gh[:, 2 * D:])
        h = (1.0 - z) * n + z * h
        hs_ref[:, pl.ds(t, 1), :] = h[:, None, :]        # one (TB, D) store per step

    hs = hs_ref[...]                                     # (TB, T, D)

    # ---- attention pooling ----------------------------------------------------
    tm = jnp.mean(hs, axis=1)                            # (TB, D)
    qtm = dot(tm, wq_ref[...]) + bq_ref[...]             # (TB, D)
    logits = jnp.sum(hs * qtm[:, None, :], axis=-1)      # (TB, T)
    m = jnp.max(logits, axis=-1, keepdims=True)
    e = jnp.exp(logits - m)
    att = e / jnp.sum(e, axis=-1, keepdims=True)         # softmax over time

    v = dot(hs.reshape(BT, D), wv_ref[...]) + bv_ref[...]  # (TB*T, D), reshape is
    v = v.reshape(TB, T, D)                                 # layout-preserving (T==8)
    pooled = jnp.sum(v * att[:, :, None], axis=1)        # (TB, D)

    # ---- MLP head: Linear -> ReLU -> (VPU H->1 reduction) -> Sigmoid ----------
    h1 = jax.nn.relu(dot(pooled, w1_ref[...]) + b1_ref[...])            # (TB, H)
    out = jax.nn.sigmoid(
        jnp.sum(h1 * w2t_ref[...], axis=-1, keepdims=True) + b2_ref[...])  # (TB, 1)
    out_ref[...] = out


# ------------------------------ host wrapper ---------------------------------
def _full_spec(shape):
    return pl.BlockSpec(shape, lambda i: (0,) * len(shape))


@jax.jit
def model4_forward(x, params):
    """x: (B, T, D) float32, mirrors the PyTorch batch_first input."""
    B, T, D = x.shape
    H = params["w1"].shape[1]

    # Fuse GRU gate weights/biases once: [r | z | n] along the output dim.
    wi3 = jnp.concatenate([params["w_ir"], params["w_iz"], params["w_in"]], axis=1)
    bi3 = jnp.concatenate([params["b_ir"], params["b_iz"], params["b_in"]], axis=1)
    wh3 = jnp.concatenate([params["w_hr"], params["w_hz"], params["w_hn"]], axis=1)
    bh3 = jnp.concatenate([params["b_hr"], params["b_hz"], params["b_hn"]], axis=1)
    w2t = params["w2"].T                                          # (1, H)

    x_flat = x.reshape(B * T, D)    # batch-major flat; free reshape, no transpose

    # Batch grid: TB must be B or a multiple of 8 (BlockSpec (8,128) rule).
    # At toy sizes grid == (1,); for larger B this tiles batches across the grid
    # ("parallel" -> megacore sharding on v7x) and bounds per-call VMEM.
    TB = B
    grid = (B // TB,)

    in_specs = [
        pl.BlockSpec((TB * T, D), lambda i: (i, 0)),              # x
        _full_spec((D, 3 * D)), _full_spec((1, 3 * D)),           # wi3, bi3
        _full_spec((D, 3 * D)), _full_spec((1, 3 * D)),           # wh3, bh3
        _full_spec((D, D)), _full_spec((1, D)),                   # wq, bq
        _full_spec((D, D)), _full_spec((1, D)),                   # wv, bv
        _full_spec((D, H)), _full_spec((1, H)),                   # w1, b1
        _full_spec((1, H)), _full_spec((1, 1)),                   # w2t, b2
    ]
    out_specs = pl.BlockSpec((TB, 1), lambda i: (i, 0))

    # Note: for large T/B/D, x should move to memory_space=pl.ANY with time-chunk
    # streaming so x + hs do not have to be fully VMEM-resident (v7x: 64 MiB VMEM).
    return pl.pallas_call(
        functools.partial(model4_kernel, seq_len=T),
        out_shape=jax.ShapeDtypeStruct((B, 1), jnp.float32),
        grid=grid,
        in_specs=in_specs,
        out_specs=out_specs,
        scratch_shapes=[pltpu.VMEM((TB, T, D), jnp.float32)],
        compiler_params=pltpu.CompilerParams(
            dimension_semantics=("parallel",)),
    )(x_flat, wi3, bi3, wh3, bh3,
      params["wq"], params["bq"], params["wv"], params["bv"],
      params["w1"], params["b1"], w2t, params["b2"])


# ------------------------------ reference (pure JAX) --------------------------
def model4_reference(x, p):
    B, T, D = x.shape

    def step(h, xt):
        r = jax.nn.sigmoid(xt @ p["w_ir"] + p["b_ir"] + h @ p["w_hr"] + p["b_hr"])
        z = jax.nn.sigmoid(xt @ p["w_iz"] + p["b_iz"] + h @ p["w_hz"] + p["b_hz"])
        n = jnp.tanh(xt @ p["w_in"] + p["b_in"] + r * (h @ p["w_hn"] + p["b_hn"]))
        h_new = (1.0 - z) * n + z * h
        return h_new, h_new

    _, hs = lax.scan(step, jnp.zeros((B, D), jnp.float32), jnp.swapaxes(x, 0, 1))
    hs = jnp.swapaxes(hs, 0, 1)                                   # (B, T, D)
    tm = hs.mean(axis=1)
    qtm = tm @ p["wq"] + p["bq"]
    att = jnp.einsum("btd,bd->bt", hs, qtm)
    att = jax.nn.softmax(att, axis=1)
    v = hs @ p["wv"] + p["bv"]
    pooled = jnp.sum(v * att[..., None], axis=1)
    h1 = jax.nn.relu(pooled @ p["w1"] + p["b1"])
    return jax.nn.sigmoid(h1 @ p["w2"] + p["b2"])


def init_params(key, D, H):
    ks = jax.random.split(key, 20)
    s = 0.2

    def mat(k, shape):
        return (s * jax.random.normal(k, shape)).astype(jnp.float32)

    names_shapes = [
        ("w_ir", (D, D)), ("w_iz", (D, D)), ("w_in", (D, D)),
        ("w_hr", (D, D)), ("w_hz", (D, D)), ("w_hn", (D, D)),
        ("b_ir", (1, D)), ("b_iz", (1, D)), ("b_in", (1, D)),
        ("b_hr", (1, D)), ("b_hz", (1, D)), ("b_hn", (1, D)),
        ("wq", (D, D)), ("bq", (1, D)),
        ("wv", (D, D)), ("bv", (1, D)),
        ("w1", (D, H)), ("b1", (1, H)),
        ("w2", (H, 1)), ("b2", (1, 1)),
    ]
    return {name: mat(k, shp) for (name, shp), k in zip(names_shapes, ks)}


if __name__ == "__main__":
    B, T, D, H = 2, 8, 32, 16          # batch, seq, input_size(=gru hidden), mlp hidden
    key = jax.random.PRNGKey(0)
    kx, kp = jax.random.split(key)
    x = jax.random.normal(kx, (B, T, D), dtype=jnp.float32)
    params = init_params(kp, D, H)

    out = jax.block_until_ready(model4_forward(x, params))
    ref = jax.block_until_ready(model4_reference(x, params))

    assert out.shape == (B, 1), out.shape
    assert jnp.allclose(out, ref, rtol=2e-3, atol=2e-3), (out, ref)

    print("KERNEL_OK")
</pallas_src>

<mosaic_0001>
module attributes {stable_mosaic.version = 11 : i64} {
  func.func @model4_kernel(%arg0: i32, %arg1: memref<16x32xf32, #tpu.memory_space<vmem>>, %arg2: memref<32x96xf32, #tpu.memory_space<vmem>>, %arg3: memref<1x96xf32, #tpu.memory_space<vmem>>, %arg4: memref<32x96xf32, #tpu.memory_space<vmem>>, %arg5: memref<1x96xf32, #tpu.memory_space<vmem>>, %arg6: memref<32x32xf32, #tpu.memory_space<vmem>>, %arg7: memref<1x32xf32, #tpu.memory_space<vmem>>, %arg8: memref<32x32xf32, #tpu.memory_space<vmem>>, %arg9: memref<1x32xf32, #tpu.memory_space<vmem>>, %arg10: memref<32x16xf32, #tpu.memory_space<vmem>>, %arg11: memref<1x16xf32, #tpu.memory_space<vmem>>, %arg12: memref<1x16xf32, #tpu.memory_space<vmem>>, %arg13: memref<1x1xf32, #tpu.memory_space<vmem>>, %arg14: memref<2x1xf32, #tpu.memory_space<vmem>>, %arg15: memref<2x8x32xf32, #tpu.memory_space<vmem>>) attributes {dimension_semantics = [#tpu.dimension_semantics<parallel>], iteration_bounds = array<i64: 1>, scalar_prefetch = 0 : i64, scratch_operands = 1 : i64, tpu.core_type = #tpu.core_type<tc>, window_params = [{transform_indices = @transform_0, window_bounds = array<i64: 16, 32>}, {pipeline_mode = #tpu.pipeline_mode<synchronous>, transform_indices = @transform_1, window_bounds = array<i64: 32, 96>}, {pipeline_mode = #tpu.pipeline_mode<synchronous>, transform_indices = @transform_2, window_bounds = array<i64: 1, 96>}, {pipeline_mode = #tpu.pipeline_mode<synchronous>, transform_indices = @transform_3, window_bounds = array<i64: 32, 96>}, {pipeline_mode = #tpu.pipeline_mode<synchronous>, transform_indices = @transform_4, window_bounds = array<i64: 1, 96>}, {pipeline_mode = #tpu.pipeline_mode<synchronous>, transform_indices = @transform_5, window_bounds = array<i64: 32, 32>}, {pipeline_mode = #tpu.pipeline_mode<synchronous>, transform_indices = @transform_6, window_bounds = array<i64: 1, 32>}, {pipeline_mode = #tpu.pipeline_mode<synchronous>, transform_indices = @transform_7, window_bounds = array<i64: 32, 32>}, {pipeline_mode = #tpu.pipeline_mode<synchronous>, transform_indices = @transform_8, window_bounds = array<i64: 1, 32>}, {pipeline_mode = #tpu.pipeline_mode<synchronous>, transform_indices = @transform_9, window_bounds = array<i64: 32, 16>}, {pipeline_mode = #tpu.pipeline_mode<synchronous>, transform_indices = @transform_10, window_bounds = array<i64: 1, 16>}, {pipeline_mode = #tpu.pipeline_mode<synchronous>, transform_indices = @transform_11, window_bounds = array<i64: 1, 16>}, {pipeline_mode = #tpu.pipeline_mode<synchronous>, transform_indices = @transform_12, window_bounds = array<i64: 1, 1>}, {transform_indices = @transform_13, window_bounds = array<i64: 2, 1>}]} {
    %c0 = arith.constant 0 : index
    %c0_0 = arith.constant 0 : index
    %0 = vector.load %arg2[%c0, %c0_0] : memref<32x96xf32, #tpu.memory_space<vmem>>, vector<32x96xf32>
    %c0_1 = arith.constant 0 : index
    %c0_2 = arith.constant 0 : index
    %1 = vector.load %arg3[%c0_1, %c0_2] : memref<1x96xf32, #tpu.memory_space<vmem>>, vector<1x96xf32>
    %c0_3 = arith.constant 0 : index
    %c0_4 = arith.constant 0 : index
    %2 = vector.load %arg4[%c0_3, %c0_4] : memref<32x96xf32, #tpu.memory_space<vmem>>, vector<32x96xf32>
    %c0_5 = arith.constant 0 : index
    %c0_6 = arith.constant 0 : index
    %3 = vector.load %arg5[%c0_5, %c0_6] : memref<1x96xf32, #tpu.memory_space<vmem>>, vector<1x96xf32>
    %c0_7 = arith.constant 0 : index
    %c0_8 = arith.constant 0 : index
    %4 = vector.load %arg1[%c0_7, %c0_8] : memref<16x32xf32, #tpu.memory_space<vmem>>, vector<16x32xf32>
    %cst = arith.constant dense<0.000000e+00> : vector<16x96xf32>
    %5 = tpu.matmul %4, %0, %cst {dimension_numbers = #tpu.dot_dimension_numbers<[1], [0], [0], [1], [0, 0, 1, 1], [], []>} : vector<16x32xf32>, vector<32x96xf32>, vector<16x96xf32> -> vector<16x96xf32>
    %6 = vector.broadcast %1 : vector<1x96xf32> to vector<16x96xf32>
    %7 = arith.addf %5, %6 : vector<16x96xf32>
    %8 = vector.shape_cast %7 : vector<16x96xf32> to vector<2x8x96xf32>
    %cst_9 = arith.constant 0.000000e+00 : f32
    %9 = vector.broadcast %cst_9 : f32 to vector<2x32xf32>
    %10 = vector.extract_strided_slice %8 {offsets = [0, 0, 0], sizes = [2, 1, 96], strides = [1, 1, 1]} : vector<2x8x96xf32> to vector<2x1x96xf32>
    %11 = vector.shape_cast %10 : vector<2x1x96xf32> to vector<2x96xf32>
    %cst_10 = arith.constant dense<0.000000e+00> : vector<2x96xf32>
    %12 = tpu.matmul %9, %2, %cst_10 {dimension_numbers = #tpu.dot_dimension_numbers<[1], [0], [0], [1], [0, 0, 1, 1], [], []>} : vector<2x32xf32>, vector<32x96xf32>, vector<2x96xf32> -> vector<2x96xf32>
    %13 = vector.broadcast %3 : vector<1x96xf32> to vector<2x96xf32>
    %14 = arith.addf %12, %13 : vector<2x96xf32>
    %15 = vector.extract_strided_slice %11 {offsets = [0, 0], sizes = [2, 32], strides = [1, 1]} : vector<2x96xf32> to vector<2x32xf32>
    %16 = vector.extract_strided_slice %14 {offsets = [0, 0], sizes = [2, 32], strides = [1, 1]} : vector<2x96xf32> to vector<2x32xf32>
    %17 = arith.addf %15, %16 : vector<2x32xf32>
    %18 = arith.negf %17 : vector<2x32xf32>
    %19 = math.exp %18 : vector<2x32xf32>
    %cst_11 = arith.constant 1.000000e+00 : f32
    %20 = vector.broadcast %cst_11 : f32 to vector<2x32xf32>
    %21 = arith.addf %20, %19 : vector<2x32xf32>
    %22 = arith.divf %20, %21 : vector<2x32xf32>
    %23 = vector.extract_strided_slice %11 {offsets = [0, 32], sizes = [2, 32], strides = [1, 1]} : vector<2x96xf32> to vector<2x32xf32>
    %24 = vector.extract_strided_slice %14 {offsets = [0, 32], sizes = [2, 32], strides = [1, 1]} : vector<2x96xf32> to vector<2x32xf32>
    %25 = arith.addf %23, %24 : vector<2x32xf32>
    %26 = arith.negf %25 : vector<2x32xf32>
    %27 = math.exp %26 : vector<2x32xf32>
    %cst_12 = arith.constant 1.000000e+00 : f32
    %28 = vector.broadcast %cst_12 : f32 to vector<2x32xf32>
    %29 = arith.addf %28, %27 : vector<2x32xf32>
    %30 = arith.divf %28, %29 : vector<2x32xf32>
    %31 = vector.extract_strided_slice %11 {offsets = [0, 64], sizes = [2, 32], strides = [1, 1]} : vector<2x96xf32> to vector<2x32xf32>
    %32 = vector.extract_strided_slice %14 {offsets = [0, 64], sizes = [2, 32], strides = [1, 1]} : vector<2x96xf32> to vector<2x32xf32>
    %33 = arith.mulf %22, %32 : vector<2x32xf32>
    %34 = arith.addf %31, %33 : vector<2x32xf32>
    %35 = math.tanh %34 : vector<2x32xf32>
    %cst_13 = arith.constant 1.000000e+00 : f32
    %36 = vector.broadcast %cst_13 : f32 to vector<2x32xf32>
    %37 = arith.subf %36, %30 : vector<2x32xf32>
    %38 = arith.mulf %37, %35 : vector<2x32xf32>
    %39 = arith.mulf %30, %9 : vector<2x32xf32>
    %40 = arith.addf %38, %39 : vector<2x32xf32>
    %41 = vector.shape_cast %40 : vector<2x32xf32> to vector<2x1x32xf32>
    %c0_14 = arith.constant 0 : index
    %c0_15 = arith.constant 0 : index
    %c0_16 = arith.constant 0 : index
    %42 = vector.load %arg15[%c0_14, %c0_15, %c0_16] : memref<2x8x32xf32, #tpu.memory_space<vmem>>, vector<2x1x32xf32>
    tpu.vector_store %arg15[%c0_14, %c0_15, %c0_16], %41 {strides = array<i32>} : memref<2x8x32xf32, #tpu.memory_space<vmem>>, vector<2x1x32xf32>,
    %43 = vector.extract_strided_slice %8 {offsets = [0, 1, 0], sizes = [2, 1, 96], strides = [1, 1, 1]} : vector<2x8x96xf32> to vector<2x1x96xf32>
    %44 = vector.shape_cast %43 : vector<2x1x96xf32> to vector<2x96xf32>
    %cst_17 = arith.constant dense<0.000000e+00> : vector<2x96xf32>
    %45 = tpu.matmul %40, %2, %cst_17 {dimension_numbers = #tpu.dot_dimension_numbers<[1], [0], [0], [1], [0, 0, 1, 1], [], []>} : vector<2x32xf32>, vector<32x96xf32>, vector<2x96xf32> -> vector<2x96xf32>
    %46 = vector.broadcast %3 : vector<1x96xf32> to vector<2x96xf32>
    %47 = arith.addf %45, %46 : vector<2x96xf32>
    %48 = vector.extract_strided_slice %44 {offsets = [0, 0], sizes = [2, 32], strides = [1, 1]} : vector<2x96xf32> to vector<2x32xf32>
    %49 = vector.extract_strided_slice %47 {offsets = [0, 0], sizes = [2, 32], strides = [1, 1]} : vector<2x96xf32> to vector<2x32xf32>
    %50 = arith.addf %48, %49 : vector<2x32xf32>
    %51 = arith.negf %50 : vector<2x32xf32>
    %52 = math.exp %51 : vector<2x32xf32>
    %cst_18 = arith.constant 1.000000e+00 : f32
    %53 = vector.broadcast %cst_18 : f32 to vector<2x32xf32>
    %54 = arith.addf %53, %52 : vector<2x32xf32>
    %55 = arith.divf %53, %54 : vector<2x32xf32>
    %56 = vector.extract_strided_slice %44 {offsets = [0, 32], sizes = [2, 32], strides = [1, 1]} : vector<2x96xf32> to vector<2x32xf32>
    %57 = vector.extract_strided_slice %47 {offsets = [0, 32], sizes = [2, 32], strides = [1, 1]} : vector<2x96xf32> to vector<2x32xf32>
    %58 = arith.addf %56, %57 : vector<2x32xf32>
    %59 = arith.negf %58 : vector<2x32xf32>
    %60 = math.exp %59 : vector<2x32xf32>
    %cst_19 = arith.constant 1.000000e+00 : f32
    %61 = vector.broadcast %cst_19 : f32 to vector<2x32xf32>
    %62 = arith.addf %61, %60 : vector<2x32xf32>
    %63 = arith.divf %61, %62 : vector<2x32xf32>
    %64 = vector.extract_strided_slice %44 {offsets = [0, 64], sizes = [2, 32], strides = [1, 1]} : vector<2x96xf32> to vector<2x32xf32>
    %65 = vector.extract_strided_slice %47 {offsets = [0, 64], sizes = [2, 32], strides = [1, 1]} : vector<2x96xf32> to vector<2x32xf32>
    %66 = arith.mulf %55, %65 : vector<2x32xf32>
    %67 = arith.addf %64, %66 : vector<2x32xf32>
    %68 = math.tanh %67 : vector<2x32xf32>
    %cst_20 = arith.constant 1.000000e+00 : f32
    %69 = vector.broadcast %cst_20 : f32 to vector<2x32xf32>
    %70 = arith.subf %69, %63 : vector<2x32xf32>
    %71 = arith.mulf %70, %68 : vector<2x32xf32>
    %72 = arith.mulf %63, %40 : vector<2x32xf32>
    %73 = arith.addf %71, %72 : vector<2x32xf32>
    %74 = vector.shape_cast %73 : vector<2x32xf32> to vector<2x1x32xf32>
    %c0_21 = arith.constant 0 : index
    %c1 = arith.constant 1 : index
    %c0_22 = arith.constant 0 : index
    %75 = vector.load %arg15[%c0_21, %c1, %c0_22] : memref<2x8x32xf32, #tpu.memory_space<vmem>>, vector<2x1x32xf32>
    tpu.vector_store %arg15[%c0_21, %c1, %c0_22], %74 {strides = array<i32>} : memref<2x8x32xf32, #tpu.memory_space<vmem>>, vector<2x1x32xf32>,
    %76 = vector.extract_strided_slice %8 {offsets = [0, 2, 0], sizes = [2, 1, 96], strides = [1, 1, 1]} : vector<2x8x96xf32> to vector<2x1x96xf32>
    %77 = vector.shape_cast %76 : vector<2x1x96xf32> to vector<2x96xf32>
    %cst_23 = arith.constant dense<0.000000e+00> : vector<2x96xf32>
    %78 = tpu.matmul %73, %2, %cst_23 {dimension_numbers = #tpu.dot_dimension_numbers<[1], [0], [0], [1], [0, 0, 1, 1], [], []>} : vector<2x32xf32>, vector<32x96xf32>, vector<2x96xf32> -> vector<2x96xf32>
    %79 = vector.broadcast %3 : vector<1x96xf32> to vector<2x96xf32>
    %80 = arith.addf %78, %79 : vector<2x96xf32>
    %81 = vector.extract_strided_slice %77 {offsets = [0, 0], sizes = [2, 32], strides = [1, 1]} : vector<2x96xf32> to vector<2x32xf32>
    %82 = vector.extract_strided_slice %80 {offsets = [0, 0], sizes = [2, 32], strides = [1, 1]} : vector<2x96xf32> to vector<2x32xf32>
    %83 = arith.addf %81, %82 : vector<2x32xf32>
    %84 = arith.negf %83 : vector<2x32xf32>
    %85 = math.exp %84 : vector<2x32xf32>
    %cst_24 = arith.constant 1.000000e+00 : f32
    %86 = vector.broadcast %cst_24 : f32 to vector<2x32xf32>
    %87 = arith.addf %86, %85 : vector<2x32xf32>
    %88 = arith.divf %86, %87 : vector<2x32xf32>
    %89 = vector.extract_strided_slice %77 {offsets = [0, 32], sizes = [2, 32], strides = [1, 1]} : vector<2x96xf32> to vector<2x32xf32>
    %90 = vector.extract_strided_slice %80 {offsets = [0, 32], sizes = [2, 32], strides = [1, 1]} : vector<2x96xf32> to vector<2x32xf32>
    %91 = arith.addf %89, %90 : vector<2x32xf32>
    %92 = arith.negf %91 : vector<2x32xf32>
    %93 = math.exp %92 : vector<2x32xf32>
    %cst_25 = arith.constant 1.000000e+00 : f32
    %94 = vector.broadcast %cst_25 : f32 to vector<2x32xf32>
    %95 = arith.addf %94, %93 : vector<2x32xf32>
    %96 = arith.divf %94, %95 : vector<2x32xf32>
    %97 = vector.extract_strided_slice %77 {offsets = [0, 64], sizes = [2, 32], strides = [1, 1]} : vector<2x96xf32> to vector<2x32xf32>
    %98 = vector.extract_strided_slice %80 {offsets = [0, 64], sizes = [2, 32], strides = [1, 1]} : vector<2x96xf32> to vector<2x32xf32>
    %99 = arith.mulf %88, %98 : vector<2x32xf32>
    %100 = arith.addf %97, %99 : vector<2x32xf32>
    %101 = math.tanh %100 : vector<2x32xf32>
    %cst_26 = arith.constant 1.000000e+00 : f32
    %102 = vector.broadcast %cst_26 : f32 to vector<2x32xf32>
    %103 = arith.subf %102, %96 : vector<2x32xf32>
    %104 = arith.mulf %103, %101 : vector<2x32xf32>
    %105 = arith.mulf %96, %73 : vector<2x32xf32>
    %106 = arith.addf %104, %105 : vector<2x32xf32>
    %107 = vector.shape_cast %106 : vector<2x32xf32> to vector<2x1x32xf32>
    %c0_27 = arith.constant 0 : index
    %c2 = arith.constant 2 : index
    %c0_28 = arith.constant 0 : index
    %108 = vector.load %arg15[%c0_27, %c2, %c0_28] : memref<2x8x32xf32, #tpu.memory_space<vmem>>, vector<2x1x32xf32>
    tpu.vector_store %arg15[%c0_27, %c2, %c0_28], %107 {strides = array<i32>} : memref<2x8x32xf32, #tpu.memory_space<vmem>>, vector<2x1x32xf32>,
    %109 = vector.extract_strided_slice %8 {offsets = [0, 3, 0], sizes = [2, 1, 96], strides = [1, 1, 1]} : vector<2x8x96xf32> to vector<2x1x96xf32>
    %110 = vector.shape_cast %109 : vector<2x1x96xf32> to vector<2x96xf32>
    %cst_29 = arith.constant dense<0.000000e+00> : vector<2x96xf32>
    %111 = tpu.matmul %106, %2, %cst_29 {dimension_numbers = #tpu.dot_dimension_numbers<[1], [0], [0], [1], [0, 0, 1, 1], [], []>} : vector<2x32xf32>, vector<32x96xf32>, vector<2x96xf32> -> vector<2x96xf32>
    %112 = vector.broadcast %3 : vector<1x96xf32> to vector<2x96xf32>
    %113 = arith.addf %111, %112 : vector<2x96xf32>
    %114 = vector.extract_strided_slice %110 {offsets = [0, 0], sizes = [2, 32], strides = [1, 1]} : vector<2x96xf32> to vector<2x32xf32>
    %115 = vector.extract_strided_slice %113 {offsets = [0, 0], sizes = [2, 32], strides = [1, 1]} : vector<2x96xf32> to vector<2x32xf32>
    %116 = arith.addf %114, %115 : vector<2x32xf32>
    %117 = arith.negf %116 : vector<2x32xf32>
    %118 = math.exp %117 : vector<2x32xf32>
    %cst_30 = arith.constant 1.000000e+00 : f32
    %119 = vector.broadcast %cst_30 : f32 to vector<2x32xf32>
    %120 = arith.addf %119, %118 : vector<2x32xf32>
    %121 = arith.divf %119, %120 : vector<2x32xf32>
    %122 = vector.extract_strided_slice %110 {offsets = [0, 32], sizes = [2, 32], strides = [1, 1]} : vector<2x96xf32> to vector<2x32xf32>
    %123 = vector.extract_strided_slice %113 {offsets = [0, 32], sizes = [2, 32], strides = [1, 1]} : vector<2x96xf32> to vector<2x32xf32>
    %124 = arith.addf %122, %123 : vector<2x32xf32>
    %125 = arith.negf %124 : vector<2x32xf32>
    %126 = math.exp %125 : vector<2x32xf32>
    %cst_31 = arith.constant 1.000000e+00 : f32
    %127 = vector.broadcast %cst_31 : f32 to vector<2x32xf32>
    %128 = arith.addf %127, %126 : vector<2x32xf32>
    %129 = arith.divf %127, %128 : vector<2x32xf32>
    %130 = vector.extract_strided_slice %110 {offsets = [0, 64], sizes = [2, 32], strides = [1, 1]} : vector<2x96xf32> to vector<2x32xf32>
    %131 = vector.extract_strided_slice %113 {offsets = [0, 64], sizes = [2, 32], strides = [1, 1]} : vector<2x96xf32> to vector<2x32xf32>
    %132 = arith.mulf %121, %131 : vector<2x32xf32>
    %133 = arith.addf %130, %132 : vector<2x32xf32>
    %134 = math.tanh %133 : vector<2x32xf32>
    %cst_32 = arith.constant 1.000000e+00 : f32
    %135 = vector.broadcast %cst_32 : f32 to vector<2x32xf32>
    %136 = arith.subf %135, %129 : vector<2x32xf32>
    %137 = arith.mulf %136, %134 : vector<2x32xf32>
    %138 = arith.mulf %129, %106 : vector<2x32xf32>
    %139 = arith.addf %137, %138 : vector<2x32xf32>
    %140 = vector.shape_cast %139 : vector<2x32xf32> to vector<2x1x32xf32>
    %c0_33 = arith.constant 0 : index
    %c3 = arith.constant 3 : index
    %c0_34 = arith.constant 0 : index
    %141 = vector.load %arg15[%c0_33, %c3, %c0_34] : memref<2x8x32xf32, #tpu.memory_space<vmem>>, vector<2x1x32xf32>
    tpu.vector_store %arg15[%c0_33, %c3, %c0_34], %140 {strides = array<i32>} : memref<2x8x32xf32, #tpu.memory_space<vmem>>, vector<2x1x32xf32>,
    %142 = vector.extract_strided_slice %8 {offsets = [0, 4, 0], sizes = [2, 1, 96], strides = [1, 1, 1]} : vector<2x8x96xf32> to vector<2x1x96xf32>
    %143 = vector.shape_cast %142 : vector<2x1x96xf32> to vector<2x96xf32>
    %cst_35 = arith.constant dense<0.000000e+00> : vector<2x96xf32>
    %144 = tpu.matmul %139, %2, %cst_35 {dimension_numbers = #tpu.dot_dimension_numbers<[1], [0], [0], [1], [0, 0, 1, 1], [], []>} : vector<2x32xf32>, vector<32x96xf32>, vector<2x96xf32> -> vector<2x96xf32>
    %145 = vector.broadcast %3 : vector<1x96xf32> to vector<2x96xf32>
    %146 = arith.addf %144, %145 : vector<2x96xf32>
    %147 = vector.extract_strided_slice %143 {offsets = [0, 0], sizes = [2, 32], strides = [1, 1]} : vector<2x96xf32> to vector<2x32xf32>
    %148 = vector.extract_strided_slice %146 {offsets = [0, 0], sizes = [2, 32], strides = [1, 1]} : vector<2x96xf32> to vector<2x32xf32>
    %149 = arith.addf %147, %148 : vector<2x32xf32>
    %150 = arith.negf %149 : vector<2x32xf32>
    %151 = math.exp %150 : vector<2x32xf32>
    %cst_36 = arith.constant 1.000000e+00 : f32
    %152 = vector.broadcast %cst_36 : f32 to vector<2x32xf32>
    %153 = arith.addf %152, %151 : vector<2x32xf32>
    %154 = arith.divf %152, %153 : vector<2x32xf32>
    %155 = vector.extract_strided_slice %143 {offsets = [0, 32], sizes = [2, 32], strides = [1, 1]} : vector<2x96xf32> to vector<2x32xf32>
    %156 = vector.extract_strided_slice %146 {offsets = [0, 32], sizes = [2, 32], strides = [1, 1]} : vector<2x96xf32> to vector<2x32xf32>
    %157 = arith.addf %155, %156 : vector<2x32xf32>
    %158 = arith.negf %157 : vector<2x32xf32>
    %159 = math.exp %158 : vector<2x32xf32>
    %cst_37 = arith.constant 1.000000e+00 : f32
    %160 = vector.broadcast %cst_37 : f32 to vector<2x32xf32>
    %161 = arith.addf %160, %159 : vector<2x32xf32>
    %162 = arith.divf %160, %161 : vector<2x32xf32>
    %163 = vector.extract_strided_slice %143 {offsets = [0, 64], sizes = [2, 32], strides = [1, 1]} : vector<2x96xf32> to vector<2x32xf32>
    %164 = vector.extract_strided_slice %146 {offsets = [0, 64], sizes = [2, 32], strides = [1, 1]} : vector<2x96xf32> to vector<2x32xf32>
    %165 = arith.mulf %154, %164 : vector<2x32xf32>
    %166 = arith.addf %163, %165 : vector<2x32xf32>
    %167 = math.tanh %166 : vector<2x32xf32>
    %cst_38 = arith.constant 1.000000e+00 : f32
    %168 = vector.broadcast %cst_38 : f32 to vector<2x32xf32>
    %169 = arith.subf %168, %162 : vector<2x32xf32>
    %170 = arith.mulf %169, %167 : vector<2x32xf32>
    %171 = arith.mulf %162, %139 : vector<2x32xf32>
    %172 = arith.addf %170, %171 : vector<2x32xf32>
    %173 = vector.shape_cast %172 : vector<2x32xf32> to vector<2x1x32xf32>
    %c0_39 = arith.constant 0 : index
    %c4 = arith.constant 4 : index
    %c0_40 = arith.constant 0 : index
    %174 = vector.load %arg15[%c0_39, %c4, %c0_40] : memref<2x8x32xf32, #tpu.memory_space<vmem>>, vector<2x1x32xf32>
    tpu.vector_store %arg15[%c0_39, %c4, %c0_40], %173 {strides = array<i32>} : memref<2x8x32xf32, #tpu.memory_space<vmem>>, vector<2x1x32xf32>,
    %175 = vector.extract_strided_slice %8 {offsets = [0, 5, 0], sizes = [2, 1, 96], strides = [1, 1, 1]} : vector<2x8x96xf32> to vector<2x1x96xf32>
    %176 = vector.shape_cast %175 : vector<2x1x96xf32> to vector<2x96xf32>
    %cst_41 = arith.constant dense<0.000000e+00> : vector<2x96xf32>
    %177 = tpu.matmul %172, %2, %cst_41 {dimension_numbers = #tpu.dot_dimension_numbers<[1], [0], [0], [1], [0, 0, 1, 1], [], []>} : vector<2x32xf32>, vector<32x96xf32>, vector<2x96xf32> -> vector<2x96xf32>
    %178 = vector.broadcast %3 : vector<1x96xf32> to vector<2x96xf32>
    %179 = arith.addf %177, %178 : vector<2x96xf32>
    %180 = vector.extract_strided_slice %176 {offsets = [0, 0], sizes = [2, 32], strides = [1, 1]} : vector<2x96xf32> to vector<2x32xf32>
    %181 = vector.extract_strided_slice %179 {offsets = [0, 0], sizes = [2, 32], strides = [1, 1]} : vector<2x96xf32> to vector<2x32xf32>
    %182 = arith.addf %180, %181 : vector<2x32xf32>
    %183 = arith.negf %182 : vector<2x32xf32>
    %184 = math.exp %183 : vector<2x32xf32>
    %cst_42 = arith.constant 1.000000e+00 : f32
    %185 = vector.broadcast %cst_42 : f32 to vector<2x32xf32>
    %186 = arith.addf %185, %184 : vector<2x32xf32>
    %187 = arith.divf %185, %186 : vector<2x32xf32>
    %188 = vector.extract_strided_slice %176 {offsets = [0, 32], sizes = [2, 32], strides = [1, 1]} : vector<2x96xf32> to vector<2x32xf32>
    %189 = vector.extract_strided_slice %179 {offsets = [0, 32], sizes = [2, 32], strides = [1, 1]} : vector<2x96xf32> to vector<2x32xf32>
    %190 = arith.addf %188, %189 : vector<2x32xf32>
    %191 = arith.negf %190 : vector<2x32xf32>
    %192 = math.exp %191 : vector<2x32xf32>
    %cst_43 = arith.constant 1.000000e+00 : f32
    %193 = vector.broadcast %cst_43 : f32 to vector<2x32xf32>
    %194 = arith.addf %193, %192 : vector<2x32xf32>
    %195 = arith.divf %193, %194 : vector<2x32xf32>
    %196 = vector.extract_strided_slice %176 {offsets = [0, 64], sizes = [2, 32], strides = [1, 1]} : vector<2x96xf32> to vector<2x32xf32>
    %197 = vector.extract_strided_slice %179 {offsets = [0, 64], sizes = [2, 32], strides = [1, 1]} : vector<2x96xf32> to vector<2x32xf32>
    %198 = arith.mulf %187, %197 : vector<2x32xf32>
    %199 = arith.addf %196, %198 : vector<2x32xf32>
    %200 = math.tanh %199 : vector<2x32xf32>
    %cst_44 = arith.constant 1.000000e+00 : f32
    %201 = vector.broadcast %cst_44 : f32 to vector<2x32xf32>
    %202 = arith.subf %201, %195 : vector<2x32xf32>
    %203 = arith.mulf %202, %200 : vector<2x32xf32>
    %204 = arith.mulf %195, %172 : vector<2x32xf32>
    %205 = arith.addf %203, %204 : vector<2x32xf32>
    %206 = vector.shape_cast %205 : vector<2x32xf32> to vector<2x1x32xf32>
    %c0_45 = arith.constant 0 : index
    %c5 = arith.constant 5 : index
    %c0_46 = arith.constant 0 : index
    %207 = vector.load %arg15[%c0_45, %c5, %c0_46] : memref<2x8x32xf32, #tpu.memory_space<vmem>>, vector<2x1x32xf32>
    tpu.vector_store %arg15[%c0_45, %c5, %c0_46], %206 {strides = array<i32>} : memref<2x8x32xf32, #tpu.memory_space<vmem>>, vector<2x1x32xf32>,
    %208 = vector.extract_strided_slice %8 {offsets = [0, 6, 0], sizes = [2, 1, 96], strides = [1, 1, 1]} : vector<2x8x96xf32> to vector<2x1x96xf32>
    %209 = vector.shape_cast %208 : vector<2x1x96xf32> to vector<2x96xf32>
    %cst_47 = arith.constant dense<0.000000e+00> : vector<2x96xf32>
    %210 = tpu.matmul %205, %2, %cst_47 {dimension_numbers = #tpu.dot_dimension_numbers<[1], [0], [0], [1], [0, 0, 1, 1], [], []>} : vector<2x32xf32>, vector<32x96xf32>, vector<2x96xf32> -> vector<2x96xf32>
    %211 = vector.broadcast %3 : vector<1x96xf32> to vector<2x96xf32>
    %212 = arith.addf %210, %211 : vector<2x96xf32>
    %213 = vector.extract_strided_slice %209 {offsets = [0, 0], sizes = [2, 32], strides = [1, 1]} : vector<2x96xf32> to vector<2x32xf32>
    %214 = vector.extract_strided_slice %212 {offsets = [0, 0], sizes = [2, 32], strides = [1, 1]} : vector<2x96xf32> to vector<2x32xf32>
    %215 = arith.addf %213, %214 : vector<2x32xf32>
    %216 = arith.negf %215 : vector<2x32xf32>
    %217 = math.exp %216 : vector<2x32xf32>
    %cst_48 = arith.constant 1.000000e+00 : f32
    %218 = vector.broadcast %cst_48 : f32 to vector<2x32xf32>
    %219 = arith.addf %218, %217 : vector<2x32xf32>
    %220 = arith.divf %218, %219 : vector<2x32xf32>
    %221 = vector.extract_strided_slice %209 {offsets = [0, 32], sizes = [2, 32], strides = [1, 1]} : vector<2x96xf32> to vector<2x32xf32>
    %222 = vector.extract_strided_slice %212 {offsets = [0, 32], sizes = [2, 32], strides = [1, 1]} : vector<2x96xf32> to vector<2x32xf32>
    %223 = arith.addf %221, %222 : vector<2x32xf32>
    %224 = arith.negf %223 : vector<2x32xf32>
    %225 = math.exp %224 : vector<2x32xf32>
    %cst_49 = arith.constant 1.000000e+00 : f32
    %226 = vector.broadcast %cst_49 : f32 to vector<2x32xf32>
    %227 = arith.addf %226, %225 : vector<2x32xf32>
    %228 = arith.divf %226, %227 : vector<2x32xf32>
    %229 = vector.extract_strided_slice %209 {offsets = [0, 64], sizes = [2, 32], strides = [1, 1]} : vector<2x96xf32> to vector<2x32xf32>
    %230 = vector.extract_strided_slice %212 {offsets = [0, 64], sizes = [2, 32], strides = [1, 1]} : vector<2x96xf32> to vector<2x32xf32>
    %231 = arith.mulf %220, %230 : vector<2x32xf32>
    %232 = arith.addf %229, %231 : vector<2x32xf32>
    %233 = math.tanh %232 : vector<2x32xf32>
    %cst_50 = arith.constant 1.000000e+00 : f32
    %234 = vector.broadcast %cst_50 : f32 to vector<2x32xf32>
    %235 = arith.subf %234, %228 : vector<2x32xf32>
    %236 = arith.mulf %235, %233 : vector<2x32xf32>
    %237 = arith.mulf %228, %205 : vector<2x32xf32>
    %238 = arith.addf %236, %237 : vector<2x32xf32>
    %239 = vector.shape_cast %238 : vector<2x32xf32> to vector<2x1x32xf32>
    %c0_51 = arith.constant 0 : index
    %c6 = arith.constant 6 : index
    %c0_52 = arith.constant 0 : index
    %240 = vector.load %arg15[%c0_51, %c6, %c0_52] : memref<2x8x32xf32, #tpu.memory_space<vmem>>, vector<2x1x32xf32>
    tpu.vector_store %arg15[%c0_51, %c6, %c0_52], %239 {strides = array<i32>} : memref<2x8x32xf32, #tpu.memory_space<vmem>>, vector<2x1x32xf32>,
    %241 = vector.extract_strided_slice %8 {offsets = [0, 7, 0], sizes = [2, 1, 96], strides = [1, 1, 1]} : vector<2x8x96xf32> to vector<2x1x96xf32>
    %242 = vector.shape_cast %241 : vector<2x1x96xf32> to vector<2x96xf32>
    %cst_53 = arith.constant dense<0.000000e+00> : vector<2x96xf32>
    %243 = tpu.matmul %238, %2, %cst_53 {dimension_numbers = #tpu.dot_dimension_numbers<[1], [0], [0], [1], [0, 0, 1, 1], [], []>} : vector<2x32xf32>, vector<32x96xf32>, vector<2x96xf32> -> vector<2x96xf32>
    %244 = vector.broadcast %3 : vector<1x96xf32> to vector<2x96xf32>
    %245 = arith.addf %243, %244 : vector<2x96xf32>
    %246 = vector.extract_strided_slice %242 {offsets = [0, 0], sizes = [2, 32], strides = [1, 1]} : vector<2x96xf32> to vector<2x32xf32>
    %247 = vector.extract_strided_slice %245 {offsets = [0, 0], sizes = [2, 32], strides = [1, 1]} : vector<2x96xf32> to vector<2x32xf32>
    %248 = arith.addf %246, %247 : vector<2x32xf32>
    %249 = arith.negf %248 : vector<2x32xf32>
    %250 = math.exp %249 : vector<2x32xf32>
    %cst_54 = arith.constant 1.000000e+00 : f32
    %251 = vector.broadcast %cst_54 : f32 to vector<2x32xf32>
    %252 = arith.addf %251, %250 : vector<2x32xf32>
    %253 = arith.divf %251, %252 : vector<2x32xf32>
    %254 = vector.extract_strided_slice %242 {offsets = [0, 32], sizes = [2, 32], strides = [1, 1]} : vector<2x96xf32> to vector<2x32xf32>
    %255 = vector.extract_strided_slice %245 {offsets = [0, 32], sizes = [2, 32], strides = [1, 1]} : vector<2x96xf32> to vector<2x32xf32>
    %256 = arith.addf %254, %255 : vector<2x32xf32>
    %257 = arith.negf %256 : vector<2x32xf32>
    %258 = math.exp %257 : vector<2x32xf32>
    %cst_55 = arith.constant 1.000000e+00 : f32
    %259 = vector.broadcast %cst_55 : f32 to vector<2x32xf32>
    %260 = arith.addf %259, %258 : vector<2x32xf32>
    %261 = arith.divf %259, %260 : vector<2x32xf32>
    %262 = vector.extract_strided_slice %242 {offsets = [0, 64], sizes = [2, 32], strides = [1, 1]} : vector<2x96xf32> to vector<2x32xf32>
    %263 = vector.extract_strided_slice %245 {offsets = [0, 64], sizes = [2, 32], strides = [1, 1]} : vector<2x96xf32> to vector<2x32xf32>
    %264 = arith.mulf %253, %263 : vector<2x32xf32>
    %265 = arith.addf %262, %264 : vector<2x32xf32>
    %266 = math.tanh %265 : vector<2x32xf32>
    %cst_56 = arith.constant 1.000000e+00 : f32
    %267 = vector.broadcast %cst_56 : f32 to vector<2x32xf32>
    %268 = arith.subf %267, %261 : vector<2x32xf32>
    %269 = arith.mulf %268, %266 : vector<2x32xf32>
    %270 = arith.mulf %261, %238 : vector<2x32xf32>
    %271 = arith.addf %269, %270 : vector<2x32xf32>
    %272 = vector.shape_cast %271 : vector<2x32xf32> to vector<2x1x32xf32>
    %c0_57 = arith.constant 0 : index
    %c7 = arith.constant 7 : index
    %c0_58 = arith.constant 0 : index
    %273 = vector.load %arg15[%c0_57, %c7, %c0_58] : memref<2x8x32xf32, #tpu.memory_space<vmem>>, vector<2x1x32xf32>
    tpu.vector_store %arg15[%c0_57, %c7, %c0_58], %272 {strides = array<i32>} : memref<2x8x32xf32, #tpu.memory_space<vmem>>, vector<2x1x32xf32>,
    %c0_59 = arith.constant 0 : index
    %c0_60 = arith.constant 0 : index
    %c0_61 = arith.constant 0 : index
    %274 = vector.load %arg15[%c0_59, %c0_60, %c0_61] : memref<2x8x32xf32, #tpu.memory_space<vmem>>, vector<2x8x32xf32>
    %cst_62 = arith.constant dense<0.000000e+00> : vector<2x32xf32>
    %275 = vector.multi_reduction <add>, %274, %cst_62 [1] : vector<2x8x32xf32> to vector<2x32xf32>
    %cst_63 = arith.constant 8.000000e+00 : f32
    %276 = vector.broadcast %cst_63 : f32 to vector<2x32xf32>
    %277 = arith.divf %275, %276 : vector<2x32xf32>
    %c0_64 = arith.constant 0 : index
    %c0_65 = arith.constant 0 : index
    %278 = vector.load %arg6[%c0_64, %c0_65] : memref<32x32xf32, #tpu.memory_space<vmem>>, vector<32x32xf32>
    %cst_66 = arith.constant dense<0.000000e+00> : vector<2x32xf32>
    %279 = tpu.matmul %277, %278, %cst_66 {dimension_numbers = #tpu.dot_dimension_numbers<[1], [0], [0], [1], [0, 0, 1, 1], [], []>} : vector<2x32xf32>, vector<32x32xf32>, vector<2x32xf32> -> vector<2x32xf32>
    %c0_67 = arith.constant 0 : index
    %c0_68 = arith.constant 0 : index
    %280 = vector.load %arg7[%c0_67, %c0_68] : memref<1x32xf32, #tpu.memory_space<vmem>>, vector<1x32xf32>
    %281 = vector.broadcast %280 : vector<1x32xf32> to vector<2x32xf32>
    %282 = arith.addf %279, %281 : vector<2x32xf32>
    %283 = vector.shape_cast %282 : vector<2x32xf32> to vector<2x1x32xf32>
    %284 = vector.broadcast %283 : vector<2x1x32xf32> to vector<2x8x32xf32>
    %285 = arith.mulf %274, %284 : vector<2x8x32xf32>
    %cst_69 = arith.constant dense<0.000000e+00> : vector<2x8xf32>
    %286 = vector.multi_reduction <add>, %285, %cst_69 [2] : vector<2x8x32xf32> to vector<2x8xf32>
    %cst_70 = arith.constant dense<0xFF800000> : vector<2xf32>
    %287 = vector.multi_reduction <maximumf>, %286, %cst_70 [1] : vector<2x8xf32> to vector<2xf32>
    %288 = vector.shape_cast %287 : vector<2xf32> to vector<2x1xf32>
    %289 = vector.broadcast %288 : vector<2x1xf32> to vector<2x8xf32>
    %290 = arith.subf %286, %289 : vector<2x8xf32>
    %291 = math.exp %290 : vector<2x8xf32>
    %cst_71 = arith.constant dense<0.000000e+00> : vector<2xf32>
    %292 = vector.multi_reduction <add>, %291, %cst_71 [1] : vector<2x8xf32> to vector<2xf32>
    %293 = vector.shape_cast %292 : vector<2xf32> to vector<2x1xf32>
    %294 = vector.broadcast %293 : vector<2x1xf32> to vector<2x8xf32>
    %295 = arith.divf %291, %294 : vector<2x8xf32>
    %296 = vector.shape_cast %274 : vector<2x8x32xf32> to vector<16x32xf32>
    %c0_72 = arith.constant 0 : index
    %c0_73 = arith.constant 0 : index
    %297 = vector.load %arg8[%c0_72, %c0_73] : memref<32x32xf32, #tpu.memory_space<vmem>>, vector<32x32xf32>
    %cst_74 = arith.constant dense<0.000000e+00> : vector<16x32xf32>
    %298 = tpu.matmul %296, %297, %cst_74 {dimension_numbers = #tpu.dot_dimension_numbers<[1], [0], [0], [1], [0, 0, 1, 1], [], []>} : vector<16x32xf32>, vector<32x32xf32>, vector<16x32xf32> -> vector<16x32xf32>
    %c0_75 = arith.constant 0 : index
    %c0_76 = arith.constant 0 : index
    %299 = vector.load %arg9[%c0_75, %c0_76] : memref<1x32xf32, #tpu.memory_space<vmem>>, vector<1x32xf32>
    %300 = vector.broadcast %299 : vector<1x32xf32> to vector<16x32xf32>
    %301 = arith.addf %298, %300 : vector<16x32xf32>
    %302 = vector.shape_cast %301 : vector<16x32xf32> to vector<2x8x32xf32>
    %303 = vector.shape_cast %295 : vector<2x8xf32> to vector<2x8x1xf32>
    %304 = vector.broadcast %303 : vector<2x8x1xf32> to vector<2x8x32xf32>
    %305 = arith.mulf %302, %304 : vector<2x8x32xf32>
    %cst_77 = arith.constant dense<0.000000e+00> : vector<2x32xf32>
    %306 = vector.multi_reduction <add>, %305, %cst_77 [1] : vector<2x8x32xf32> to vector<2x32xf32>
    %c0_78 = arith.constant 0 : index
    %c0_79 = arith.constant 0 : index
    %307 = vector.load %arg10[%c0_78, %c0_79] : memref<32x16xf32, #tpu.memory_space<vmem>>, vector<32x16xf32>
    %cst_80 = arith.constant dense<0.000000e+00> : vector<2x16xf32>
    %308 = tpu.matmul %306, %307, %cst_80 {dimension_numbers = #tpu.dot_dimension_numbers<[1], [0], [0], [1], [0, 0, 1, 1], [], []>} : vector<2x32xf32>, vector<32x16xf32>, vector<2x16xf32> -> vector<2x16xf32>
    %c0_81 = arith.constant 0 : index
    %c0_82 = arith.constant 0 : index
    %309 = vector.load %arg11[%c0_81, %c0_82] : memref<1x16xf32, #tpu.memory_space<vmem>>, vector<1x16xf32>
    %310 = vector.broadcast %309 : vector<1x16xf32> to vector<2x16xf32>
    %311 = arith.addf %308, %310 : vector<2x16xf32>
    %cst_83 = arith.constant 0.000000e+00 : f32
    %312 = vector.broadcast %cst_83 : f32 to vector<2x16xf32>
    %313 = arith.maximumf %311, %312 : vector<2x16xf32>
    %c0_84 = arith.constant 0 : index
    %c0_85 = arith.constant 0 : index
    %314 = vector.load %arg12[%c0_84, %c0_85] : memref<1x16xf32, #tpu.memory_space<vmem>>, vector<1x16xf32>
    %315 = vector.broadcast %314 : vector<1x16xf32> to vector<2x16xf32>
    %316 = arith.mulf %313, %315 : vector<2x16xf32>
    %cst_86 = arith.constant dense<0.000000e+00> : vector<2xf32>
    %317 = vector.multi_reduction <add>, %316, %cst_86 [1] : vector<2x16xf32> to vector<2xf32>
    %318 = vector.shape_cast %317 : vector<2xf32> to vector<2x1xf32>
    %c0_87 = arith.constant 0 : index
    %c0_88 = arith.constant 0 : index
    %319 = vector.load %arg13[%c0_87, %c0_88] : memref<1x1xf32, #tpu.memory_space<vmem>>, vector<1x1xf32>
    %320 = vector.broadcast %319 : vector<1x1xf32> to vector<2x1xf32>
    %321 = arith.addf %318, %320 : vector<2x1xf32>
    %322 = arith.negf %321 : vector<2x1xf32>
    %323 = math.exp %322 : vector<2x1xf32>
    %cst_89 = arith.constant 1.000000e+00 : f32
    %324 = vector.broadcast %cst_89 : f32 to vector<2x1xf32>
    %325 = arith.addf %324, %323 : vector<2x1xf32>
    %326 = arith.divf %324, %325 : vector<2x1xf32>
    %c0_90 = arith.constant 0 : index
    %c0_91 = arith.constant 0 : index
    %327 = vector.load %arg14[%c0_90, %c0_91] : memref<2x1xf32, #tpu.memory_space<vmem>>, vector<2x1xf32>
    tpu.vector_store %arg14[%c0_90, %c0_91], %326 {strides = array<i32>} : memref<2x1xf32, #tpu.memory_space<vmem>>, vector<2x1xf32>,
    return
  }
  func.func @transform_0(%arg0: i32) -> (i32, i32) {
    %c0_i32 = arith.constant 0 : i32
    %c0_i32_0 = arith.constant 0 : i32
    return %arg0, %c0_i32 : i32, i32
  }
  func.func @transform_1(%arg0: i32) -> (i32, i32) {
    %c0_i32 = arith.constant 0 : i32
    %c0_i32_0 = arith.constant 0 : i32
    %c0_i32_1 = arith.constant 0 : i32
    return %c0_i32, %c0_i32_0 : i32, i32
  }
  func.func @transform_2(%arg0: i32) -> (i32, i32) {
    %c0_i32 = arith.constant 0 : i32
    %c0_i32_0 = arith.constant 0 : i32
    %c0_i32_1 = arith.constant 0 : i32
    return %c0_i32, %c0_i32_0 : i32, i32
  }
  func.func @transform_3(%arg0: i32) -> (i32, i32) {
    %c0_i32 = arith.constant 0 : i32
    %c0_i32_0 = arith.constant 0 : i32
    %c0_i32_1 = arith.constant 0 : i32
    return %c0_i32, %c0_i32_0 : i32, i32
  }
  func.func @transform_4(%arg0: i32) -> (i32, i32) {
    %c0_i32 = arith.constant 0 : i32
    %c0_i32_0 = arith.constant 0 : i32
    %c0_i32_1 = arith.constant 0 : i32
    return %c0_i32, %c0_i32_0 : i32, i32
  }
  func.func @transform_5(%arg0: i32) -> (i32, i32) {
    %c0_i32 = arith.constant 0 : i32
    %c0_i32_0 = arith.constant 0 : i32
    %c0_i32_1 = arith.constant 0 : i32
    return %c0_i32, %c0_i32_0 : i32, i32
  }
  func.func @transform_6(%arg0: i32) -> (i32, i32) {
    %c0_i32 = arith.constant 0 : i32
    %c0_i32_0 = arith.constant 0 : i32
    %c0_i32_1 = arith.constant 0 : i32
    return %c0_i32, %c0_i32_0 : i32, i32
  }
  func.func @transform_7(%arg0: i32) -> (i32, i32) {
    %c0_i32 = arith.constant 0 : i32
    %c0_i32_0 = arith.constant 0 : i32
    %c0_i32_1 = arith.constant 0 : i32
    return %c0_i32, %c0_i32_0 : i32, i32
  }
  func.func @transform_8(%arg0: i32) -> (i32, i32) {
    %c0_i32 = arith.constant 0 : i32
    %c0_i32_0 = arith.constant 0 : i32
    %c0_i32_1 = arith.constant 0 : i32
    return %c0_i32, %c0_i32_0 : i32, i32
  }
  func.func @transform_9(%arg0: i32) -> (i32, i32) {
    %c0_i32 = arith.constant 0 : i32
    %c0_i32_0 = arith.constant 0 : i32
    %c0_i32_1 = arith.constant 0 : i32
    return %c0_i32, %c0_i32_0 : i32, i32
  }
  func.func @transform_10(%arg0: i32) -> (i32, i32) {
    %c0_i32 = arith.constant 0 : i32
    %c0_i32_0 = arith.constant 0 : i32
    %c0_i32_1 = arith.constant 0 : i32
    return %c0_i32, %c0_i32_0 : i32, i32
  }
  func.func @transform_11(%arg0: i32) -> (i32, i32) {
    %c0_i32 = arith.constant 0 : i32
    %c0_i32_0 = arith.constant 0 : i32
    %c0_i32_1 = arith.constant 0 : i32
    return %c0_i32, %c0_i32_0 : i32, i32
  }
  func.func @transform_12(%arg0: i32) -> (i32, i32) {
    %c0_i32 = arith.constant 0 : i32
    %c0_i32_0 = arith.constant 0 : i32
    %c0_i32_1 = arith.constant 0 : i32
    return %c0_i32, %c0_i32_0 : i32, i32
  }
  func.func @transform_13(%arg0: i32) -> (i32, i32) {
    %c0_i32 = arith.constant 0 : i32
    %c0_i32_0 = arith.constant 0 : i32
    return %arg0, %c0_i32 : i32, i32
  }
}

</mosaic_0001>

<bundles_post_ra>
// kernel: model4_forward.1
= control target key start
LH: loop header
LB: loop body
LE: loop exit
PB: predicated region body
PF: predicated region fallthrough
CT: control target
= control target key end

     0   :  { %v2194_v0 = vmov 0.0|0.0   ;;  %vm2195_vm0 = vmmov 0   ;;  %v2196_v4 = vmov 0.0   ;;  %vm64_vm1 = vcmask 261120   ;;  %s2197_s27 = smov 64   ;;  %s2646_s1 = inlined_call_operand.vmem [shape: f32[32,96], index: 1, kind: input, shape index: {}]   ;;  %s2647_s3 = inlined_call_operand.vmem [shape: f32[32,96], index: 3, kind: input, shape index: {}]   ;;  %s2648_s0 = inlined_call_operand.vmem [shape: f32[16,32], index: 0, kind: input, shape index: {}]   ;;  %s2649_s4 = inlined_call_operand.vmem [shape: f32[1,96], index: 4, kind: input, shape index: {}]   ;;  %s2650_s2 = inlined_call_operand.vmem [shape: f32[1,96], index: 2, kind: input, shape index: {}]   ;;  %s2651_s7 = inlined_call_operand.vmem [shape: f32[32,32], index: 7, kind: input, shape index: {}]   ;;  %s2652_s5 = inlined_call_operand.vmem [shape: f32[32,32], index: 5, kind: input, shape index: {}]   ;;  %s2653_s6 = inlined_call_operand.vmem [shape: f32[1,32], index: 6, kind: input, shape index: {}]   ;;  %s2654_s9 = inlined_call_operand.vmem [shape: f32[32,16], index: 9, kind: input, shape index: {}]   ;;  %s2655_s8 = inlined_call_operand.vmem [shape: f32[1,32], index: 8, kind: input, shape index: {}]   ;;  %s2656_s12 = inlined_call_operand.<no memory space> [shape: f32[1,1], index: 12, kind: input, shape index: {}]   ;;  %s2657_s10 = inlined_call_operand.vmem [shape: f32[1,16], index: 10, kind: input, shape index: {}]   ;;  %s2658_s11 = inlined_call_operand.vmem [shape: f32[1,16], index: 11, kind: input, shape index: {}]   ;;  %s2659_s13 = inlined_call_operand.vmem [shape: f32[2,1], index: 13, kind: output, shape index: {}]  }
   0x1   :  { %2009 = vmatprep.subr.bf16.mxu1 %v2194_v0  ;;  %v46_v1 = vld [vmem:[%s2646_s1] sm:$0xff]  ;;  %v47_v2 = vld [vmem:[%s2646_s1 + $0x8] sm:$0xff]  ;;  %1888 = vmatprep.mubr.msk.f32.mxu1 %vm2195_vm0, %v2196_v4  ;;  %v48_v7 = vld [vmem:[%s2646_s1 + $0x10] sm:$0xff]  ;;  %vm291_vm2 = vcmask 1041409   ;;  %vm287_vm3 = vcmask 253952   ;;  %vm432_vm4 = vcmask 254977  }
   0x2   :  { %v51_v3 = vld [vmem:[%s2647_s3] sm:$0xff]  ;;  %v2001_v5 = vpack.c.bf16 %v47_v2, %v46_v1  ;;  %v52_v6 = vld [vmem:[%s2647_s3 + $0x8] sm:$0xff]  ;;  %v49_v8 = vld [vmem:[%s2646_s1 + $0x18] sm:$0xff]  ;;  %vm578_vm5 = vcmask 256002   ;;  %vm725_vm6 = vcmask 257027   ;;  %vm872_vm7 = vcmask 258052  }
   0x3   :  { %v2292_v9 = vpack.c.bf16 %v52_v6, %v51_v3  ;;  %v2005_v10 = vpack.c.bf16 %v49_v8, %v48_v7  ;;  %v53_v11 = vld [vmem:[%s2647_s3 + $0x10] sm:$0xff]  ;;  %v54_v12 = vld [vmem:[%s2647_s3 + $0x18] sm:$0xff]  ;;  %v56_v13 = vld [vmem:[%s2648_s0] sm:$0xff]  ;;  %vm1019_vm8 = vcmask 259077   ;;  %vm1166_vm9 = vcmask 260102  }
   0x4   :  { %2002 = vmatprep.subr.bf16.mxu0 %v2001_v5  ;;  %1877 = vmatprep.mubr.msk.f32.mxu0 %vm64_vm1, %v56_v13  ;;  %v2305_v14 = vpack.c.bf16 %v54_v12, %v53_v11  ;;  %v57_v15 = vld [vmem:[%s2648_s0 + $0x8] sm:$0xff]  ;;  %v2331_v16 = vld [vmem:[%s2649_s4] ss:$0 sm:$0xff]  ;;  %vm1313_vm10 = vcmask 261127   ;;  %vm1476_vm11 = vcmask 58368   ;;  %vm1746_vm12 = vcmask 123904  }
   0x5   :  { %2011 = vmatpush3.bf16.msra.mxu1 %v2292_v9  ;;  %2004 = vmatpush3.bf16.msra.mxu0 %v2001_v5  ;;  %v1770_v23 = vld [vmem:[%s2650_s2] ss:$0 sm:$0xff]  ;;  %s2198_s2 = smov 96   ;;  %vm1764_vm13 = vcmask 1024  }
   0x6   :  { %2012 = vmatprep.subr.bf16.mxu1 %v2194_v0  ;;  %2006 = vmatprep.subr.bf16.mxu0 %v2005_v10 }
   0x9   :  { %2014 = vmatpush3.bf16.msra.mxu1 %v2305_v14  ;;  %2008 = vmatpush3.bf16.msra.mxu0 %v2005_v10 }
   0xa   :  { %2015 = vmatprep.subr.bf16.mxu0 %v2194_v0  ;;  %2021 = vmatprep.subr.bf16.mxu1 %v2194_v0 }
   0xc   :  { %1889 = vmatmul.mubr.f32.vlgmr.msra.gmra.mrb[0].mxu1 %v2196_v4  ;;  %1878 = vmatmul.mubr.msk.f32.vlgmr.msra.gmra.mrb[0].mxu0 %vm64_vm1, %v57_v15 }
   0xd   :  { %2017 = vmatpush3.bf16.msra.mxu0 %v2292_v9  ;;  %1899 = vmatprep.mubr.msk.f32.mxu0 %vm2195_vm0, %v2196_v4 }
   0xe   :  { %2018 = vmatprep.subr.bf16.mxu0 %v2194_v0  ;;  %2023 = vmatpush3.bf16.msra.mxu1 %v2292_v9 }
   0xf   :  { %2024 = vmatprep.subr.bf16.mxu1 %v2194_v0  ;;  %1910 = vmatprep.mubr.msk.f32.mxu1 %vm2195_vm0, %v2196_v4 }
  0x11   :  { %2020 = vmatpush3.bf16.msra.mxu0 %v2305_v14 }
  0x12   :  { %2026 = vmatpush3.bf16.msra.mxu1 %v2305_v14  ;;  %2027 = vmatprep.subr.bf16.mxu0 %v2194_v0 }
  0x13   :  { %2033 = vmatprep.subr.bf16.mxu1 %v2194_v0 }
  0xdf   :  { %v221_v17 = vpop.f32.mrb[0].mxu1  ;;  %v1879_v18 = vpop.f32.mrb[0].mxu0 }
  0xe0   :  { %v222_v19 = vadd.f32 %v2331_v16, %v221_v17  ;;  %v1890_v20 = vpop.f32.mrb[1].mxu1  ;;  %v137_v21 = vpop.f32.mrb[1].mxu0  ;;  %v2339_v24 = vadd.f32 %v1879_v18, %v1770_v23 }
  0xe1   :  { %v2341_v25 = vadd.f32 %v1770_v23, %v137_v21 }
  0xe2   :  { %v226_v22 = vrot.slane %v222_v19, 1 }
  0xe3   :  { %v229_v28 = vadd.f32 %v222_v19, %v2341_v25 }
  0xe4   :  { %245 = vrot.lane.b32.xlu0 %v226_v22, %s2197_s27  ;;  %v230_v26 = vadd.f32 %v226_v22, %v2339_v24 }
  0xe5   :  { %v1774_v29 = vmul.f32 -1.442695, %v229_v28 }
  0xe6   :  { %v1775_v27 = vmul.f32 -1.442695, %v230_v26 }
  0xe8   :  { %243 = vrot.lane.b32.xlu0 %v222_v19, %s2197_s27  ;;  %2086 = vpow2.f32 %v1775_v27 }
  0xe9   :  { %2088 = vpow2.f32 %v1774_v29 }
  0xf2   :  { %v2087_v30 = vpop.eup %2086 }
  0xf3   :  { %v238_v31 = vadd.f32 1.0, %v2087_v30  ;;  %v2089_v32 = vpop.eup %2088 }
  0xf4   :  { %v237_v33 = vadd.f32 1.0, %v2089_v32 }
  0xf5   :  { %2090 = vrcp.f32 %v238_v31 }
  0xf6   :  { %2092 = vrcp.f32 %v237_v33 }
  0xff   :  { %v2091_v34 = vpop.eup %2090 }
 0x100   :  { %v2093_v37 = vpop.eup %2092  ;;  %v264_v46 = vsub.f32 1.0, %v2091_v34  ;;  %v276_v48 = vmul.f32 0.0, %v2091_v34 }
 0x101   :  { %v263_v51 = vsub.f32 1.0, %v2093_v37  ;;  %v275_v53 = vmul.f32 0.0, %v2093_v37 }
 0x156   :  { %v246_v35 = vpop.permute.xlu0 %245 }
 0x157   :  { %v250_v36 = vmul.f32 %v2091_v34, %v246_v35 }
 0x159   :  { %255 = vrot.lane.b32.xlu1 %v250_v36, %s2197_s27 }
 0x15a   :  { %v244_v38 = vpop.permute.xlu0 %243 }
 0x15b   :  { %v249_v39 = vmul.f32 %v2093_v37, %v244_v38 }
 0x15d   :  { %253 = vrot.lane.b32.xlu1 %v249_v39, %s2197_s27 }
 0x1cb   :  { %v256_v40 = vpop.permute.xlu1 %255 }
 0x1cc   :  { %v260_v41 = vadd.f32 %v256_v40, %v2339_v24 }
 0x1ce   :  { %2094 = vtanh.f32 %v260_v41 }
 0x1cf   :  { %v254_v42 = vpop.permute.xlu1 %253 }
 0x1d0   :  { %v259_v43 = vadd.f32 %v254_v42, %v2341_v25 }
 0x1d2   :  { %2096 = vtanh.f32 %v259_v43 }
 0x1d8   :  { %v2095_v44 = vpop.eup %2094 }
 0x1d9   :  { %269 = vrot.lane.b32.xlu0 %v2095_v44, %s2198_s2 }
 0x1dc   :  { %v2097_v45 = vpop.eup %2096 }
 0x1dd   :  { %267 = vrot.lane.b32.xlu1 %v2097_v45, %s2198_s2 }
 0x24b   :  { %v270_v47 = vpop.permute.xlu0 %269 }
 0x24c   :  { %v274_v49 = vmul.f32 %v270_v47, %v264_v46 }
 0x24e   :  { %v2351_v50 = vadd.f32 %v276_v48, %v274_v49 }
 0x24f   :  { %v268_v52 = vpop.permute.xlu1 %267 }
 0x250   :  { %v273_v54 = vmul.f32 %v268_v52, %v263_v51  ;;  %v290_v55 = vrot.slane %v2351_v50, 7 }
 0x252   :  { %v2354_v56 = vadd.f32 %v275_v53, %v273_v54 }
 0x254   :  { %v292_v57 = vsel %vm291_vm2, %v290_v55, %v2354_v56  ;;  %v417_v29 = vrot.slane %v2354_v56, 7 }
 0x255   :  { %293 = vrot.lane.b32.xlu0 %v292_v57, %s2198_s2 }
 0x2c7   :  { %v294_v58 = vpop.permute.xlu0 %293 }
 0x2c8   :  { %1900 = vmatmul.mubr.msk.f32.vlgmr.msra.gmra.mrb[2].mxu0 %vm64_vm1, %v294_v58 }
 0x2c9   :  { %2029 = vmatpush3.bf16.msra.mxu0 %v2292_v9  ;;  %1921 = vmatprep.mubr.msk.f32.mxu0 %vm2195_vm0, %v2196_v4 }
 0x2ca   :  { %2030 = vmatprep.subr.bf16.mxu0 %v2194_v0 }
 0x2cd   :  { %2032 = vmatpush3.bf16.msra.mxu0 %v2305_v14 }
 0x2ce   :  { %2039 = vmatprep.subr.bf16.mxu0 %v2194_v0 }
 0x39b   :  { %v363_v59 = vpop.f32.mrb[2].mxu0 }
 0x39c   :  { %v364_v60 = vadd.f32 %v2331_v16, %v363_v59  ;;  %v1901_v61 = vpop.f32.mrb[3].mxu0 }
 0x39e   :  { %387 = vrot.lane.b32.xlu0 %v364_v60, %s2197_s27  ;;  %v368_v62 = vrot.slane %v364_v60, 7  ;;  %v372_v63 = vadd.f32 %v364_v60, %v2339_v24 }
 0x3a0   :  { %385 = vrot.lane.b32.xlu1 %v368_v62, %s2197_s27  ;;  %v371_v1 = vadd.f32 %v368_v62, %v2341_v25  ;;  %v1778_v2 = vmul.f32 -1.442695, %v372_v63 }
 0x3a2   :  { %v1777_v3 = vmul.f32 -1.442695, %v371_v1  ;;  %2098 = vpow2.f32 %v1778_v2 }
 0x3a4   :  { %2100 = vpow2.f32 %v1777_v3 }
 0x3ac   :  { %v2099_v5 = vpop.eup %2098 }
 0x3ad   :  { %v380_v7 = vadd.f32 1.0, %v2099_v5 }
 0x3ae   :  { %v2101_v6 = vpop.eup %2100 }
 0x3af   :  { %v379_v8 = vadd.f32 1.0, %v2101_v6  ;;  %2102 = vrcp.f32 %v380_v7 }
 0x3b1   :  { %2104 = vrcp.f32 %v379_v8 }
 0x3b9   :  { %v2103_v10 = vpop.eup %2102 }
 0x3ba   :  { %v406_v27 = vsub.f32 1.0, %v2103_v10  ;;  %v421_v34 = vmul.f32 %v2103_v10, %v290_v55 }
 0x3bb   :  { %v2105_v13 = vpop.eup %2104 }
 0x3bc   :  { %v405_v28 = vsub.f32 1.0, %v2105_v13  ;;  %v420_v32 = vmul.f32 %v2105_v13, %v417_v29 }
 0x410   :  { %v388_v11 = vpop.permute.xlu0 %387 }
 0x411   :  { %v392_v12 = vmul.f32 %v2103_v10, %v388_v11 }
 0x412   :  { %v386_v15 = vpop.permute.xlu1 %385 }
 0x413   :  { %v391_v17 = vmul.f32 %v2105_v13, %v386_v15  ;;  %397 = vrot.lane.b32.xlu0 %v392_v12, %s2197_s27 }
 0x415   :  { %395 = vrot.lane.b32.xlu1 %v391_v17, %s2197_s27 }
 0x485   :  { %v398_v18 = vpop.permute.xlu0 %397 }
 0x486   :  { %v402_v19 = vadd.f32 %v398_v18, %v2339_v24 }
 0x487   :  { %v396_v20 = vpop.permute.xlu1 %395 }
 0x488   :  { %2106 = vtanh.f32 %v402_v19  ;;  %v401_v21 = vadd.f32 %v396_v20, %v2341_v25 }
 0x48a   :  { %2108 = vtanh.f32 %v401_v21 }
 0x492   :  { %v2107_v22 = vpop.eup %2106 }
 0x493   :  { %411 = vrot.lane.b32.xlu0 %v2107_v22, %s2198_s2 }
 0x494   :  { %v2109_v23 = vpop.eup %2108 }
 0x495   :  { %409 = vrot.lane.b32.xlu1 %v2109_v23, %s2198_s2 }
 0x505   :  { %v412_v26 = vpop.permute.xlu0 %411 }
 0x506   :  { %v416_v31 = vmul.f32 %v412_v26, %v406_v27 }
 0x507   :  { %v410_v30 = vpop.permute.xlu1 %409 }
 0x508   :  { %v415_v33 = vmul.f32 %v410_v30, %v405_v28  ;;  %v2380_v36 = vadd.f32 %v421_v34, %v416_v31 }
 0x50a   :  { %v2378_v35 = vadd.f32 %v420_v32, %v415_v33  ;;  %v563_v6 = vrot.slane %v2380_v36, 7 }
 0x50c   :  { %v435_v37 = vrot.slane %v2378_v35, 1  ;;  %v562_v10 = vrot.slane %v2378_v35, 7 }
 0x50e   :  { %v436_v38 = vsel %vm291_vm2, %v2380_v36, %v435_v37 }
 0x50f   :  { %437 = vrot.lane.b32.xlu1 %v436_v38, %s2198_s2 }
 0x581   :  { %v438_v39 = vpop.permute.xlu1 %437 }
 0x582   :  { %1911 = vmatmul.mubr.msk.f32.vlgmr.msra.gmra.mrb[2].mxu1 %vm64_vm1, %v438_v39 }
 0x583   :  { %2035 = vmatpush3.bf16.msra.mxu1 %v2292_v9  ;;  %1932 = vmatprep.mubr.msk.f32.mxu1 %vm2195_vm0, %v2196_v4 }
 0x584   :  { %2036 = vmatprep.subr.bf16.mxu1 %v2194_v0 }
 0x587   :  { %2038 = vmatpush3.bf16.msra.mxu1 %v2305_v14 }
 0x588   :  { %2045 = vmatprep.subr.bf16.mxu1 %v2194_v0 }
 0x655   :  { %v507_v40 = vpop.f32.mrb[2].mxu1 }
 0x656   :  { %v508_v41 = vadd.f32 %v2331_v16, %v507_v40  ;;  %v1912_v42 = vpop.f32.mrb[3].mxu1 }
 0x658   :  { %v512_v43 = vrot.slane %v508_v41, 6  ;;  %v513_v44 = vrot.slane %v508_v41, 7 }
 0x65a   :  { %532 = vrot.lane.b32.xlu1 %v513_v44, %s2197_s27  ;;  %530 = vrot.lane.b32.xlu0 %v512_v43, %s2197_s27  ;;  %v516_v45 = vadd.f32 %v512_v43, %v2341_v25  ;;  %v517_v46 = vadd.f32 %v513_v44, %v2339_v24 }
 0x65c   :  { %v1780_v47 = vmul.f32 -1.442695, %v516_v45  ;;  %v1781_v48 = vmul.f32 -1.442695, %v517_v46 }
 0x65e   :  { %2110 = vpow2.f32 %v1780_v47 }
 0x65f   :  { %2112 = vpow2.f32 %v1781_v48 }
 0x668   :  { %v2111_v49 = vpop.eup %2110 }
 0x669   :  { %v2113_v51 = vpop.eup %2112  ;;  %v524_v52 = vadd.f32 1.0, %v2111_v49 }
 0x66a   :  { %v525_v53 = vadd.f32 1.0, %v2113_v51 }
 0x66b   :  { %2114 = vrcp.f32 %v524_v52 }
 0x66c   :  { %2116 = vrcp.f32 %v525_v53 }
 0x675   :  { %v2115_v54 = vpop.eup %2114 }
 0x676   :  { %v2117_v55 = vpop.eup %2116  ;;  %v550_v8 = vsub.f32 1.0, %v2115_v54  ;;  %v566_v15 = vmul.f32 %v2115_v54, %v562_v10 }
 0x677   :  { %v551_v5 = vsub.f32 1.0, %v2117_v55  ;;  %v567_v11 = vmul.f32 %v2117_v55, %v563_v6 }
 0x6cc   :  { %v533_v57 = vpop.permute.xlu1 %532  ;;  %v531_v58 = vpop.permute.xlu0 %530 }
 0x6cd   :  { %v537_v59 = vmul.f32 %v2117_v55, %v533_v57  ;;  %v536_v60 = vmul.f32 %v2115_v54, %v531_v58 }
 0x6cf   :  { %542 = vrot.lane.b32.xlu1 %v537_v59, %s2197_s27  ;;  %540 = vrot.lane.b32.xlu0 %v536_v60, %s2197_s27 }
 0x741   :  { %v543_v61 = vpop.permute.xlu1 %542  ;;  %v541_v62 = vpop.permute.xlu0 %540 }
 0x742   :  { %v547_v63 = vadd.f32 %v543_v61, %v2339_v24  ;;  %v546_v1 = vadd.f32 %v541_v62, %v2341_v25 }
 0x744   :  { %2118 = vtanh.f32 %v547_v63 }
 0x745   :  { %2120 = vtanh.f32 %v546_v1 }
 0x74e   :  { %v2119_v2 = vpop.eup %2118 }
 0x74f   :  { %v2121_v3 = vpop.eup %2120  ;;  %556 = vrot.lane.b32.xlu1 %v2119_v2, %s2198_s2 }
 0x750   :  { %554 = vrot.lane.b32.xlu0 %v2121_v3, %s2198_s2 }
 0x7c1   :  { %v557_v7 = vpop.permute.xlu1 %556 }
 0x7c2   :  { %v561_v12 = vmul.f32 %v557_v7, %v551_v5  ;;  %v555_v13 = vpop.permute.xlu0 %554 }
 0x7c3   :  { %v560_v17 = vmul.f32 %v555_v13, %v550_v8 }
 0x7c4   :  { %v2406_v18 = vadd.f32 %v567_v11, %v561_v12 }
 0x7c5   :  { %v2408_v19 = vadd.f32 %v566_v15, %v560_v17 }
 0x7c6   :  { %v582_v20 = vrot.slane %v2406_v18, 1  ;;  %v710_v55 = vrot.slane %v2406_v18, 7 }
 0x7c7   :  { %v581_v21 = vrot.slane %v2408_v19, 2  ;;  %v709_v59 = vrot.slane %v2408_v19, 7 }
 0x7c9   :  { %v583_v22 = vsel %vm291_vm2, %v582_v20, %v581_v21 }
 0x7ca   :  { %584 = vrot.lane.b32.xlu0 %v583_v22, %s2198_s2 }
 0x83c   :  { %v585_v23 = vpop.permute.xlu0 %584 }
 0x83d   :  { %1922 = vmatmul.mubr.msk.f32.vlgmr.msra.gmra.mrb[4].mxu0 %vm64_vm1, %v585_v23 }
 0x83e   :  { %2041 = vmatpush3.bf16.msra.mxu0 %v2292_v9  ;;  %1943 = vmatprep.mubr.msk.f32.mxu0 %vm2195_vm0, %v2196_v4 }
 0x83f   :  { %2042 = vmatprep.subr.bf16.mxu0 %v2194_v0 }
 0x842   :  { %2044 = vmatpush3.bf16.msra.mxu0 %v2305_v14 }
 0x843   :  { %2051 = vmatprep.subr.bf16.mxu0 %v2194_v0 }
 0x910   :  { %v654_v26 = vpop.f32.mrb[4].mxu0 }
 0x911   :  { %v655_v27 = vadd.f32 %v2331_v16, %v654_v26  ;;  %v1923_v28 = vpop.f32.mrb[5].mxu0 }
 0x913   :  { %v659_v29 = vrot.slane %v655_v27, 5  ;;  %v660_v30 = vrot.slane %v655_v27, 6 }
 0x915   :  { %679 = vrot.lane.b32.xlu0 %v660_v30, %s2197_s27  ;;  %677 = vrot.lane.b32.xlu1 %v659_v29, %s2197_s27  ;;  %v663_v31 = vadd.f32 %v659_v29, %v2341_v25  ;;  %v664_v32 = vadd.f32 %v660_v30, %v2339_v24 }
 0x917   :  { %v1783_v33 = vmul.f32 -1.442695, %v663_v31  ;;  %v1784_v34 = vmul.f32 -1.442695, %v664_v32 }
 0x919   :  { %2122 = vpow2.f32 %v1783_v33 }
 0x91a   :  { %2124 = vpow2.f32 %v1784_v34 }
 0x923   :  { %v2123_v37 = vpop.eup %2122 }
 0x924   :  { %v2125_v38 = vpop.eup %2124  ;;  %v671_v39 = vadd.f32 1.0, %v2123_v37 }
 0x925   :  { %v672_v40 = vadd.f32 1.0, %v2125_v38 }
 0x926   :  { %2126 = vrcp.f32 %v671_v39 }
 0x927   :  { %2128 = vrcp.f32 %v672_v40 }
 0x930   :  { %v2127_v41 = vpop.eup %2126 }
 0x931   :  { %v2129_v42 = vpop.eup %2128  ;;  %v697_v58 = vsub.f32 1.0, %v2127_v41  ;;  %v713_v63 = vmul.f32 %v2127_v41, %v709_v59 }
 0x932   :  { %v698_v54 = vsub.f32 1.0, %v2129_v42  ;;  %v714_v60 = vmul.f32 %v2129_v42, %v710_v55 }
 0x987   :  { %v680_v43 = vpop.permute.xlu0 %679  ;;  %v678_v44 = vpop.permute.xlu1 %677 }
 0x988   :  { %v684_v45 = vmul.f32 %v2129_v42, %v680_v43  ;;  %v683_v46 = vmul.f32 %v2127_v41, %v678_v44 }
 0x98a   :  { %689 = vrot.lane.b32.xlu0 %v684_v45, %s2197_s27  ;;  %687 = vrot.lane.b32.xlu1 %v683_v46, %s2197_s27 }
 0x9fc   :  { %v690_v47 = vpop.permute.xlu0 %689  ;;  %v688_v48 = vpop.permute.xlu1 %687 }
 0x9fd   :  { %v694_v49 = vadd.f32 %v690_v47, %v2339_v24  ;;  %v693_v51 = vadd.f32 %v688_v48, %v2341_v25 }
 0x9ff   :  { %2130 = vtanh.f32 %v694_v49 }
 0xa00   :  { %2132 = vtanh.f32 %v693_v51 }
 0xa09   :  { %v2131_v52 = vpop.eup %2130 }
 0xa0a   :  { %v2133_v53 = vpop.eup %2132  ;;  %703 = vrot.lane.b32.xlu0 %v2131_v52, %s2198_s2 }
 0xa0b   :  { %701 = vrot.lane.b32.xlu1 %v2133_v53, %s2198_s2 }
 0xa7c   :  { %v704_v57 = vpop.permute.xlu0 %703 }
 0xa7d   :  { %v708_v61 = vmul.f32 %v704_v57, %v698_v54  ;;  %v702_v62 = vpop.permute.xlu1 %701 }
 0xa7e   :  { %v707_v1 = vmul.f32 %v702_v62, %v697_v58 }
 0xa7f   :  { %v2434_v2 = vadd.f32 %v714_v60, %v708_v61 }
 0xa80   :  { %v2436_v3 = vadd.f32 %v713_v63, %v707_v1 }
 0xa81   :  { %v729_v5 = vrot.slane %v2434_v2, 2  ;;  %v857_v44 = vrot.slane %v2434_v2, 7 }
 0xa82   :  { %v728_v6 = vrot.slane %v2436_v3, 3  ;;  %v856_v47 = vrot.slane %v2436_v3, 7 }
 0xa84   :  { %v730_v7 = vsel %vm291_vm2, %v729_v5, %v728_v6 }
 0xa85   :  { %731 = vrot.lane.b32.xlu1 %v730_v7, %s2198_s2 }
 0xaf7   :  { %v732_v8 = vpop.permute.xlu1 %731 }
 0xaf8   :  { %1933 = vmatmul.mubr.msk.f32.vlgmr.msra.gmra.mrb[4].mxu1 %vm64_vm1, %v732_v8 }
 0xaf9   :  { %2047 = vmatpush3.bf16.msra.mxu1 %v2292_v9  ;;  %1954 = vmatprep.mubr.msk.f32.mxu1 %vm2195_vm0, %v2196_v4 }
 0xafa   :  { %2048 = vmatprep.subr.bf16.mxu1 %v2194_v0 }
 0xafd   :  { %2050 = vmatpush3.bf16.msra.mxu1 %v2305_v14 }
 0xafe   :  { %2057 = vmatprep.subr.bf16.mxu1 %v2194_v0 }
 0xbcb   :  { %v801_v10 = vpop.f32.mrb[4].mxu1 }
 0xbcc   :  { %v802_v11 = vadd.f32 %v2331_v16, %v801_v10  ;;  %v1934_v12 = vpop.f32.mrb[5].mxu1 }
 0xbce   :  { %v806_v13 = vrot.slane %v802_v11, 4  ;;  %v807_v15 = vrot.slane %v802_v11, 5 }
 0xbd0   :  { %826 = vrot.lane.b32.xlu1 %v807_v15, %s2197_s27  ;;  %824 = vrot.lane.b32.xlu0 %v806_v13, %s2197_s27  ;;  %v810_v17 = vadd.f32 %v806_v13, %v2341_v25  ;;  %v811_v20 = vadd.f32 %v807_v15, %v2339_v24 }
 0xbd2   :  { %v1786_v21 = vmul.f32 -1.442695, %v810_v17  ;;  %v1787_v22 = vmul.f32 -1.442695, %v811_v20 }
 0xbd4   :  { %2134 = vpow2.f32 %v1786_v21 }
 0xbd5   :  { %2136 = vpow2.f32 %v1787_v22 }
 0xbde   :  { %v2135_v23 = vpop.eup %2134 }
 0xbdf   :  { %v2137_v26 = vpop.eup %2136  ;;  %v818_v27 = vadd.f32 1.0, %v2135_v23 }
 0xbe0   :  { %v819_v28 = vadd.f32 1.0, %v2137_v26 }
 0xbe1   :  { %2138 = vrcp.f32 %v818_v27 }
 0xbe2   :  { %2140 = vrcp.f32 %v819_v28 }
 0xbeb   :  { %v2139_v29 = vpop.eup %2138 }
 0xbec   :  { %v2141_v30 = vpop.eup %2140  ;;  %v844_v46 = vsub.f32 1.0, %v2139_v29  ;;  %v860_v52 = vmul.f32 %v2139_v29, %v856_v47 }
 0xbed   :  { %v845_v43 = vsub.f32 1.0, %v2141_v30  ;;  %v861_v48 = vmul.f32 %v2141_v30, %v857_v44 }
 0xc42   :  { %v827_v31 = vpop.permute.xlu1 %826  ;;  %v825_v32 = vpop.permute.xlu0 %824 }
 0xc43   :  { %v831_v33 = vmul.f32 %v2141_v30, %v827_v31  ;;  %v830_v34 = vmul.f32 %v2139_v29, %v825_v32 }
 0xc45   :  { %836 = vrot.lane.b32.xlu1 %v831_v33, %s2197_s27  ;;  %834 = vrot.lane.b32.xlu0 %v830_v34, %s2197_s27 }
 0xcb7   :  { %v837_v37 = vpop.permute.xlu1 %836  ;;  %v835_v38 = vpop.permute.xlu0 %834 }
 0xcb8   :  { %v841_v39 = vadd.f32 %v837_v37, %v2339_v24  ;;  %v840_v40 = vadd.f32 %v835_v38, %v2341_v25 }
 0xcba   :  { %2142 = vtanh.f32 %v841_v39 }
 0xcbb   :  { %2144 = vtanh.f32 %v840_v40 }
 0xcc4   :  { %v2143_v41 = vpop.eup %2142 }
 0xcc5   :  { %v2145_v42 = vpop.eup %2144  ;;  %850 = vrot.lane.b32.xlu1 %v2143_v41, %s2198_s2 }
 0xcc6   :  { %848 = vrot.lane.b32.xlu0 %v2145_v42, %s2198_s2 }
 0xd37   :  { %v851_v45 = vpop.permute.xlu1 %850 }
 0xd38   :  { %v855_v49 = vmul.f32 %v851_v45, %v845_v43  ;;  %v849_v51 = vpop.permute.xlu0 %848 }
 0xd39   :  { %v854_v53 = vmul.f32 %v849_v51, %v844_v46 }
 0xd3a   :  { %v2462_v54 = vadd.f32 %v861_v48, %v855_v49 }
 0xd3b   :  { %v2464_v55 = vadd.f32 %v860_v52, %v854_v53 }
 0xd3c   :  { %v876_v57 = vrot.slane %v2462_v54, 3  ;;  %v1004_v32 = vrot.slane %v2462_v54, 7 }
 0xd3d   :  { %v875_v58 = vrot.slane %v2464_v55, 4  ;;  %v1003_v37 = vrot.slane %v2464_v55, 7 }
 0xd3f   :  { %v877_v59 = vsel %vm291_vm2, %v876_v57, %v875_v58 }
 0xd40   :  { %878 = vrot.lane.b32.xlu0 %v877_v59, %s2198_s2 }
 0xdb2   :  { %v879_v60 = vpop.permute.xlu0 %878 }
 0xdb3   :  { %1944 = vmatmul.mubr.msk.f32.vlgmr.msra.gmra.mrb[6].mxu0 %vm64_vm1, %v879_v60 }
 0xdb4   :  { %2053 = vmatpush3.bf16.msra.mxu0 %v2292_v9  ;;  %1965 = vmatprep.mubr.msk.f32.mxu0 %vm2195_vm0, %v2196_v4 }
 0xdb5   :  { %2054 = vmatprep.subr.bf16.mxu0 %v2194_v0 }
 0xdb8   :  { %2056 = vmatpush3.bf16.msra.mxu0 %v2305_v14 }
 0xe86   :  { %v948_v61 = vpop.f32.mrb[6].mxu0 }
 0xe87   :  { %v949_v62 = vadd.f32 %v2331_v16, %v948_v61  ;;  %v1945_v63 = vpop.f32.mrb[7].mxu0 }
 0xe89   :  { %v953_v1 = vrot.slane %v949_v62, 3  ;;  %v954_v5 = vrot.slane %v949_v62, 4 }
 0xe8b   :  { %973 = vrot.lane.b32.xlu0 %v954_v5, %s2197_s27  ;;  %971 = vrot.lane.b32.xlu1 %v953_v1, %s2197_s27  ;;  %v957_v6 = vadd.f32 %v953_v1, %v2341_v25  ;;  %v958_v9 = vadd.f32 %v954_v5, %v2339_v24 }
 0xe8d   :  { %v1789_v7 = vmul.f32 -1.442695, %v957_v6  ;;  %v1790_v8 = vmul.f32 -1.442695, %v958_v9 }
 0xe8f   :  { %2146 = vpow2.f32 %v1789_v7 }
 0xe90   :  { %2148 = vpow2.f32 %v1790_v8 }
 0xe99   :  { %v2147_v10 = vpop.eup %2146 }
 0xe9a   :  { %v2149_v14 = vpop.eup %2148  ;;  %v965_v11 = vadd.f32 1.0, %v2147_v10 }
 0xe9b   :  { %v966_v12 = vadd.f32 1.0, %v2149_v14 }
 0xe9c   :  { %2150 = vrcp.f32 %v965_v11 }
 0xe9d   :  { %2152 = vrcp.f32 %v966_v12 }
 0xea6   :  { %v2151_v13 = vpop.eup %2150 }
 0xea7   :  { %v2153_v15 = vpop.eup %2152  ;;  %v991_v34 = vsub.f32 1.0, %v2151_v13  ;;  %v1007_v41 = vmul.f32 %v2151_v13, %v1003_v37 }
 0xea8   :  { %v992_v31 = vsub.f32 1.0, %v2153_v15  ;;  %v1008_v38 = vmul.f32 %v2153_v15, %v1004_v32 }
 0xefd   :  { %v974_v17 = vpop.permute.xlu0 %973  ;;  %v972_v20 = vpop.permute.xlu1 %971 }
 0xefe   :  { %v978_v21 = vmul.f32 %v2153_v15, %v974_v17  ;;  %v977_v22 = vmul.f32 %v2151_v13, %v972_v20 }
 0xf00   :  { %983 = vrot.lane.b32.xlu0 %v978_v21, %s2197_s27  ;;  %981 = vrot.lane.b32.xlu1 %v977_v22, %s2197_s27 }
 0xf72   :  { %v984_v23 = vpop.permute.xlu0 %983  ;;  %v982_v26 = vpop.permute.xlu1 %981 }
 0xf73   :  { %v988_v27 = vadd.f32 %v984_v23, %v2339_v24  ;;  %v987_v28 = vadd.f32 %v982_v26, %v2341_v25 }
 0xf75   :  { %2154 = vtanh.f32 %v988_v27 }
 0xf76   :  { %2156 = vtanh.f32 %v987_v28 }
 0xf7f   :  { %v2155_v29 = vpop.eup %2154 }
 0xf80   :  { %v2157_v30 = vpop.eup %2156  ;;  %997 = vrot.lane.b32.xlu0 %v2155_v29, %s2198_s2 }
 0xf81   :  { %995 = vrot.lane.b32.xlu1 %v2157_v30, %s2198_s2 }
 0xff2   :  { %v998_v33 = vpop.permute.xlu0 %997 }
 0xff3   :  { %v1002_v39 = vmul.f32 %v998_v33, %v992_v31  ;;  %v996_v40 = vpop.permute.xlu1 %995 }
 0xff4   :  { %v1001_v42 = vmul.f32 %v996_v40, %v991_v34 }
 0xff5   :  { %v2489_v43 = vadd.f32 %v1008_v38, %v1002_v39 }
 0xff6   :  { %v2491_v44 = vadd.f32 %v1007_v41, %v1001_v42 }
 0xff7   :  { %v1023_v45 = vrot.slane %v2489_v43, 4  ;;  %v1151_v22 = vrot.slane %v2489_v43, 7 }
 0xff8   :  { %v1022_v46 = vrot.slane %v2491_v44, 5  ;;  %v1150_v27 = vrot.slane %v2491_v44, 7 }
 0xffa   :  { %v1024_v47 = vsel %vm291_vm2, %v1023_v45, %v1022_v46 }
 0xffb   :  { %1025 = vrot.lane.b32.xlu1 %v1024_v47, %s2198_s2 }
0x106d   :  { %v1026_v48 = vpop.permute.xlu1 %1025 }
0x106e   :  { %1955 = vmatmul.mubr.msk.f32.vlgmr.msra.gmra.mrb[6].mxu1 %vm64_vm1, %v1026_v48 }
0x106f   :  { %1976 = vmatprep.mubr.msk.f32.mxu1 %vm2195_vm0, %v2196_v4 }
0x1141   :  { %v1095_v49 = vpop.f32.mrb[6].mxu1 }
0x1142   :  { %v1096_v51 = vadd.f32 %v2331_v16, %v1095_v49  ;;  %v1956_v52 = vpop.f32.mrb[7].mxu1 }
0x1144   :  { %v1100_v53 = vrot.slane %v1096_v51, 2  ;;  %v1101_v57 = vrot.slane %v1096_v51, 3 }
0x1146   :  { %1120 = vrot.lane.b32.xlu1 %v1101_v57, %s2197_s27  ;;  %1118 = vrot.lane.b32.xlu0 %v1100_v53, %s2197_s27  ;;  %v1104_v58 = vadd.f32 %v1100_v53, %v2341_v25  ;;  %v1105_v59 = vadd.f32 %v1101_v57, %v2339_v24 }
0x1148   :  { %v1792_v60 = vmul.f32 -1.442695, %v1104_v58  ;;  %v1793_v61 = vmul.f32 -1.442695, %v1105_v59 }
0x114a   :  { %2158 = vpow2.f32 %v1792_v60 }
0x114b   :  { %2160 = vpow2.f32 %v1793_v61 }
0x1154   :  { %v2159_v62 = vpop.eup %2158 }
0x1155   :  { %v2161_v63 = vpop.eup %2160  ;;  %v1112_v1 = vadd.f32 1.0, %v2159_v62 }
0x1156   :  { %v1113_v5 = vadd.f32 1.0, %v2161_v63 }
0x1157   :  { %2162 = vrcp.f32 %v1112_v1 }
0x1158   :  { %2164 = vrcp.f32 %v1113_v5 }
0x1161   :  { %v2163_v6 = vpop.eup %2162 }
0x1162   :  { %v2165_v9 = vpop.eup %2164  ;;  %v1138_v26 = vsub.f32 1.0, %v2163_v6  ;;  %v1154_v31 = vmul.f32 %v2163_v6, %v1150_v27  ;;  %v1337_v27 = vld [vmem:[%s2652_s5 + $0x10] sm:$0xff] }
0x1163   :  { %v1139_v21 = vsub.f32 1.0, %v2165_v9  ;;  %v1155_v28 = vmul.f32 %v2165_v9, %v1151_v22 }
0x11b8   :  { %v1121_v7 = vpop.permute.xlu1 %1120  ;;  %v1119_v8 = vpop.permute.xlu0 %1118 }
0x11b9   :  { %v1125_v10 = vmul.f32 %v2165_v9, %v1121_v7  ;;  %v1124_v14 = vmul.f32 %v2163_v6, %v1119_v8 }
0x11bb   :  { %1130 = vrot.lane.b32.xlu1 %v1125_v10, %s2197_s27  ;;  %1128 = vrot.lane.b32.xlu0 %v1124_v14, %s2197_s27 }
0x122d   :  { %v1131_v11 = vpop.permute.xlu1 %1130  ;;  %v1129_v12 = vpop.permute.xlu0 %1128 }
0x122e   :  { %v1135_v13 = vadd.f32 %v1131_v11, %v2339_v24  ;;  %v1134_v15 = vadd.f32 %v1129_v12, %v2341_v25 }
0x1230   :  { %2166 = vtanh.f32 %v1135_v13 }
0x1231   :  { %2168 = vtanh.f32 %v1134_v15 }
0x123a   :  { %v2167_v17 = vpop.eup %2166 }
0x123b   :  { %v2169_v20 = vpop.eup %2168  ;;  %1144 = vrot.lane.b32.xlu1 %v2167_v17, %s2198_s2 }
0x123c   :  { %1142 = vrot.lane.b32.xlu0 %v2169_v20, %s2198_s2  ;;  %v1335_v20 = vld [vmem:[%s2652_s5] sm:$0xff] }
0x12ad   :  { %v1145_v23 = vpop.permute.xlu1 %1144 }
0x12ae   :  { %v1149_v29 = vmul.f32 %v1145_v23, %v1139_v21  ;;  %v1143_v30 = vpop.permute.xlu0 %1142  ;;  %v1336_v21 = vld [vmem:[%s2652_s5 + $0x8] sm:$0xff] }
0x12af   :  { %v1148_v32 = vmul.f32 %v1143_v30, %v1138_v26  ;;  %v2058_v23 = vpack.c.bf16 %v1336_v21, %v1335_v20 }
0x12b0   :  { %v2513_v33 = vadd.f32 %v1155_v28, %v1149_v29  ;;  %v1338_v28 = vld [vmem:[%s2652_s5 + $0x18] sm:$0xff] }
0x12b1   :  { %v2515_v34 = vadd.f32 %v1154_v31, %v1148_v32  ;;  %2059 = vmatpush3.bf16.msra.mxu1 %v2058_v23  ;;  %v2061_v29 = vpack.c.bf16 %v1338_v28, %v1337_v27 }
0x12b2   :  { %v1170_v37 = vrot.slane %v2513_v33, 5  ;;  %2060 = vmatprep.subr.bf16.mxu1 %v2194_v0 }
0x12b3   :  { %v1169_v38 = vrot.slane %v2515_v34, 6 }
0x12b5   :  { %v1171_v39 = vsel %vm291_vm2, %v1170_v37, %v1169_v38  ;;  %2062 = vmatpush3.bf16.msra.mxu1 %v2061_v29  ;;  %v2200_v29 = vmov 0  }
0x12b6   :  { %1172 = vrot.lane.b32.xlu0 %v1171_v39, %s2198_s2  ;;  %2071 = vmatprep.subr.bf16.mxu1 %v2194_v0 }
0x12b7   :  { %2085 = vset.pattern.permute.xlu0 %v2200_v29  ;;  %2084 = vset.pattern.permute.xlu1 %v2200_v29 }
0x1328   :  { %v1173_v40 = vpop.permute.xlu0 %1172 }
0x1329   :  { %1966 = vmatmul.mubr.msk.f32.vlgmr.msra.gmra.mrb[8].mxu0 %vm64_vm1, %v1173_v40 }
0x13fc   :  { %v1242_v41 = vpop.f32.mrb[8].mxu0 }
0x13fd   :  { %v1243_v42 = vadd.f32 %v2331_v16, %v1242_v41  ;;  %v1967_v45 = vpop.f32.mrb[9].mxu0 }
0x13ff   :  { %v1247_v46 = vrot.slane %v1243_v42, 1  ;;  %v1248_v47 = vrot.slane %v1243_v42, 2 }
0x1401   :  { %1267 = vrot.lane.b32.xlu0 %v1248_v47, %s2197_s27  ;;  %1265 = vrot.lane.b32.xlu1 %v1247_v46, %s2197_s27  ;;  %v1251_v48 = vadd.f32 %v1247_v46, %v2341_v25  ;;  %v1252_v49 = vadd.f32 %v1248_v47, %v2339_v24 }
0x1403   :  { %v1795_v51 = vmul.f32 -1.442695, %v1251_v48  ;;  %v1796_v52 = vmul.f32 -1.442695, %v1252_v49 }
0x1405   :  { %2170 = vpow2.f32 %v1795_v51 }
0x1406   :  { %2172 = vpow2.f32 %v1796_v52 }
0x140f   :  { %v2171_v53 = vpop.eup %2170 }
0x1410   :  { %v2173_v57 = vpop.eup %2172  ;;  %v1259_v58 = vadd.f32 1.0, %v2171_v53 }
0x1411   :  { %v1260_v59 = vadd.f32 1.0, %v2173_v57 }
0x1412   :  { %2174 = vrcp.f32 %v1259_v58 }
0x1413   :  { %2176 = vrcp.f32 %v1260_v59 }
0x141c   :  { %v2175_v16 = vpop.eup %2174 }
0x141d   :  { %v2177_v60 = vpop.eup %2176 }
0x1473   :  { %v1268_v61 = vpop.permute.xlu0 %1267  ;;  %v1266_v62 = vpop.permute.xlu1 %1265 }
0x1474   :  { %v1272_v63 = vmul.f32 %v2177_v60, %v1268_v61  ;;  %v1271_v1 = vmul.f32 %v2175_v16, %v1266_v62 }
0x1476   :  { %1277 = vrot.lane.b32.xlu0 %v1272_v63, %s2197_s27  ;;  %1275 = vrot.lane.b32.xlu1 %v1271_v1, %s2197_s27 }
0x14e8   :  { %v1278_v5 = vpop.permute.xlu0 %1277  ;;  %v1276_v6 = vpop.permute.xlu1 %1275 }
0x14e9   :  { %v1282_v9 = vadd.f32 %v1278_v5, %v2339_v24  ;;  %v1281_v7 = vadd.f32 %v1276_v6, %v2341_v25  ;;  %v1533_v24 = vld [vmem:[%s2651_s7] sm:$0xff]  ;;  %v1534_v25 = vld [vmem:[%s2651_s7 + $0x8] sm:$0xff] }
0x14eb   :  { %2178 = vtanh.f32 %v1282_v9 }
0x14ec   :  { %2180 = vtanh.f32 %v1281_v7 }
0x14f5   :  { %v2179_v8 = vpop.eup %2178 }
0x14f6   :  { %v2181_v10 = vpop.eup %2180  ;;  %1291 = vrot.lane.b32.xlu0 %v2179_v8, %s2198_s2 }
0x14f7   :  { %1289 = vrot.lane.b32.xlu1 %v2181_v10, %s2198_s2  ;;  %v2199_v10 = vmov 1966171168  }
0x14fa   :  { %283 = vrot.lane.b32.xlu0 %v2351_v50, %s2198_s2  ;;  %v2063_v50 = vpack.c.bf16 %v1534_v25, %v1533_v24  ;;  %v1423_v24 = vunpack.c.l.s4 %v2199_v10  ;;  %v1425_v25 = vlaneseq }
0x14fb   :  { %281 = vrot.lane.b32.xlu1 %v2354_v56, %s2198_s2  ;;  %v1535_v56 = vld [vmem:[%s2651_s7 + $0x10] sm:$0xff] }
0x14fc   :  { %2064 = vmatprep.subr.bf16.mxu0 %v2063_v50 }
0x14fd   :  { %2066 = vmatpush3.bf16.msra.mxu0 %v2063_v50  ;;  %v1424_v50 = vunpack.c.0.s8 %v1423_v24 }
0x14fe   :  { %428 = vrot.lane.b32.xlu0 %v2380_v36, %s2198_s2 }
0x14ff   :  { %426 = vrot.lane.b32.xlu1 %v2378_v35, %s2198_s2  ;;  %v1536_v35 = vld [vmem:[%s2651_s7 + $0x18] sm:$0xff] }
0x1500   :  { %v2067_v36 = vpack.c.bf16 %v1536_v35, %v1535_v56  ;;  %v1426_v56 = vshrl.u32 %v1425_v25, 7  ;;  %v1797_v35 = vld [vmem:[%s2653_s6] ss:$0 sm:$0xff] }
0x1502   :  { %574 = vrot.lane.b32.xlu0 %v2406_v18, %s2198_s2  ;;  %2068 = vmatprep.subr.bf16.mxu0 %v2067_v36  ;;  %v1286_v18 = vsub.f32 1.0, %v2177_v60 }
0x1503   :  { %572 = vrot.lane.b32.xlu1 %v2408_v19, %s2198_s2  ;;  %v1298_v19 = vrot.slane %v2513_v33, 7  ;;  %2070 = vmatpush3.bf16.msra.mxu0 %v2067_v36  ;;  %v1427_v36 = vsub.s32 %v1424_v50, %v1426_v56 }
0x1506   :  { %721 = vrot.lane.b32.xlu0 %v2434_v2, %s2198_s2 }
0x1507   :  { %719 = vrot.lane.b32.xlu1 %v2436_v3, %s2198_s2  ;;  %v1285_v3 = vsub.f32 1.0, %v2175_v16 }
0x150a   :  { %868 = vrot.lane.b32.xlu0 %v2462_v54, %s2198_s2  ;;  %v1297_v54 = vrot.slane %v2515_v34, 7 }
0x150b   :  { %866 = vrot.lane.b32.xlu1 %v2464_v55, %s2198_s2  ;;  %v1302_v55 = vmul.f32 %v2177_v60, %v1298_v19 }
0x150c   :  { %v1301_v14 = vmul.f32 %v2175_v16, %v1297_v54  ;;  %v1446_v54 = vsub.s32 0, %v1426_v56 }
0x150e   :  { %1015 = vrot.lane.b32.xlu0 %v2489_v43, %s2198_s2 }
0x150f   :  { %1013 = vrot.lane.b32.xlu1 %v2491_v44, %s2198_s2 }
0x1512   :  { %1162 = vrot.lane.b32.xlu0 %v2513_v33, %s2198_s2 }
0x1513   :  { %1160 = vrot.lane.b32.xlu1 %v2515_v34, %s2198_s2 }
0x1568   :  { %v1292_v2 = vpop.permute.xlu0 %1291 }
0x1569   :  { %v1296_v43 = vmul.f32 %v1292_v2, %v1286_v18  ;;  %v1290_v44 = vpop.permute.xlu1 %1289 }
0x156a   :  { %v1295_v11 = vmul.f32 %v1290_v44, %v1285_v3 }
0x156b   :  { %v1304_v12 = vadd.f32 %v1302_v55, %v1296_v43 }
0x156c   :  { %v1303_v13 = vadd.f32 %v1301_v14, %v1295_v11  ;;  %v284_v15 = vpop.permute.xlu0 %283 }
0x156d   :  { %289 = vst.msk [vmem:[#allocation2 + $0x8] sm:$0x1] %vm287_vm3, %v284_v15  ;;  %v282_v17 = vpop.permute.xlu1 %281  ;;  %1309 = vrot.lane.b32.xlu0 %v1304_v12, %s2198_s2 }
0x156e   :  { %288 = vst.msk [vmem:[#allocation2] sm:$0x1] %vm287_vm3, %v282_v17  ;;  %1307 = vrot.lane.b32.xlu1 %v1303_v13, %s2198_s2  ;;  %v1465_v17 = vand.u32 127, %v1425_v25 }
0x1570   :  { %v429_v22 = vpop.permute.xlu0 %428  ;;  %v1468_v20 = vsub.s32 %v1465_v17, %v1426_v56 }
0x1571   :  { %434 = vst.msk [vmem:[#allocation2 + $0x8] sm:$0x2] %vm432_vm4, %v429_v22  ;;  %v427_v26 = vpop.permute.xlu1 %426 }
0x1572   :  { %433 = vst.msk [vmem:[#allocation2] sm:$0x2] %vm432_vm4, %v427_v26 }
0x1574   :  { %v575_v30 = vpop.permute.xlu0 %574 }
0x1575   :  { %580 = vst.msk [vmem:[#allocation2 + $0x8] sm:$0x4] %vm578_vm5, %v575_v30  ;;  %v573_v31 = vpop.permute.xlu1 %572  ;;  %v1487_v30 = vsub.s32 1, %v1426_v56 }
0x1576   :  { %579 = vst.msk [vmem:[#allocation2] sm:$0x4] %vm578_vm5, %v573_v31 }
0x1578   :  { %v722_v32 = vpop.permute.xlu0 %721 }
0x1579   :  { %727 = vst.msk [vmem:[#allocation2 + $0x8] sm:$0x8] %vm725_vm6, %v722_v32  ;;  %v720_v33 = vpop.permute.xlu1 %719 }
0x157a   :  { %726 = vst.msk [vmem:[#allocation2] sm:$0x8] %vm725_vm6, %v720_v33 }
0x157c   :  { %v869_v34 = vpop.permute.xlu0 %868 }
0x157d   :  { %874 = vst.msk [vmem:[#allocation2 + $0x8] sm:$0x10] %vm872_vm7, %v869_v34  ;;  %v867_v37 = vpop.permute.xlu1 %866 }
0x157e   :  { %873 = vst.msk [vmem:[#allocation2] sm:$0x10] %vm872_vm7, %v867_v37 }
0x1580   :  { %v1016_v38 = vpop.permute.xlu0 %1015 }
0x1581   :  { %1021 = vst.msk [vmem:[#allocation2 + $0x8] sm:$0x20] %vm1019_vm8, %v1016_v38  ;;  %v1014_v39 = vpop.permute.xlu1 %1013 }
0x1582   :  { %1020 = vst.msk [vmem:[#allocation2] sm:$0x20] %vm1019_vm8, %v1014_v39 }
0x1584   :  { %v1163_v40 = vpop.permute.xlu0 %1162 }
0x1585   :  { %1168 = vst.msk [vmem:[#allocation2 + $0x8] sm:$0x40] %vm1166_vm9, %v1163_v40  ;;  %v1161_v41 = vpop.permute.xlu1 %1160 }
0x1586   :  { %1167 = vst.msk [vmem:[#allocation2] sm:$0x40] %vm1166_vm9, %v1161_v41 }
0x15df   :  { %v1310_v42 = vpop.permute.xlu0 %1309 }
0x15e0   :  { %1315 = vst.msk [vmem:[#allocation2 + $0x8] sm:$0x80] %vm1313_vm10, %v1310_v42  ;;  %v1308_v45 = vpop.permute.xlu1 %1307 }
0x15e1   :  { %1314 = vst.msk [vmem:[#allocation2] sm:$0x80] %vm1313_vm10, %v1308_v45 }
0x15e7   :  { %v1317_v46 = vld [vmem:[#allocation2 + $0x8] sm:$0xff] }
0x15e8   :  { %v1316_v47 = vld [vmem:[#allocation2] sm:$0xff]  ;;  %v1325_v48 = vsel %vm64_vm1, %v1317_v46, 0.0 }
0x15e9   :  { %v1318_v49 = vsel %vm64_vm1, %v1316_v47, 0.0  ;;  %1987 = vmatprep.mubr.msk.f32.mxu0 %vm64_vm1, %v1316_v47  ;;  %v1326_v51 = vrot.slane %v1325_v48, 4 }
0x15ea   :  { %v1319_v52 = vrot.slane %v1318_v49, 4  ;;  %1988 = vmatmul.mubr.msk.f32.vlgmr.msra.gmra.mrb[10].mxu0 %vm64_vm1, %v1317_v46 }
0x15eb   :  { %v1327_v53 = vadd.f32 %v1326_v51, %v1325_v48 }
0x15ec   :  { %v1320_v57 = vadd.f32 %v1319_v52, %v1318_v49 }
0x15ed   :  { %v1328_v58 = vrot.slane %v1327_v53, 2 }
0x15ee   :  { %v1321_v59 = vrot.slane %v1320_v57, 2 }
0x15ef   :  { %v1329_v16 = vadd.f32 %v1328_v58, %v1327_v53 }
0x15f0   :  { %v1322_v60 = vadd.f32 %v1321_v59, %v1320_v57 }
0x15f1   :  { %v1330_v61 = vrot.slane %v1329_v16, 1 }
0x15f2   :  { %v1323_v62 = vrot.slane %v1322_v60, 1 }
0x15f3   :  { %v1331_v63 = vadd.f32 %v1330_v61, %v1329_v16  ;;  %v1652_v61 = vld [vmem:[%s2654_s9 + $0x8] sm:$0xff] }
0x15f4   :  { %v1324_v1 = vadd.f32 %v1323_v62, %v1322_v60  ;;  %v1651_v60 = vld [vmem:[%s2654_s9] sm:$0xff] }
0x15f5   :  { %v1334_v5 = vmul.f32 0.125, %v1331_v63  ;;  %v2072_v62 = vpack.c.bf16 %v1652_v61, %v1651_v60  ;;  %v1653_v63 = vld [vmem:[%s2654_s9 + $0x10] sm:$0xff] }
0x15f6   :  { %v1333_v6 = vmul.f32 0.125, %v1324_v1  ;;  %v1654_v1 = vld [vmem:[%s2654_s9 + $0x18] sm:$0xff] }
0x15f8   :  { %v1348_v9 = vsel %vm291_vm2, %v1334_v5, %v1333_v6  ;;  %v2075_v5 = vpack.c.bf16 %v1654_v1, %v1653_v63  ;;  %v1799_v6 = vld [vmem:[%s2655_s8] ss:$0 sm:$0xff] }
0x15f9   :  { %1977 = vmatmul.mubr.msk.f32.vlgmr.msra.gmra.mrb[8].mxu1 %vm64_vm1, %v1348_v9 }
0x15fa   :  { %1998 = vmatprep.mubr.msk.f32.mxu1 %vm2195_vm0, %v2196_v4  ;;  %2073 = vmatpush3.bf16.msra.mxu1 %v2072_v62 }
0x15fb   :  { %2074 = vmatprep.subr.bf16.mxu1 %v2194_v0 }
0x15fe   :  { %2076 = vmatpush3.bf16.msra.mxu1 %v2075_v5 }
0x16bd   :  { %v2599_v7 = vpop.f32.mrb[10].mxu0 }
0x16be   :  { %v2601_v8 = vpop.f32.mrb[11].mxu0  ;;  %v1622_v0 = vadd.f32 %v2599_v7, %v1799_v6 }
0x16bf   :  { %v1617_v9 = vadd.f32 %v1799_v6, %v2601_v8 }
0x16cc   :  { %v1417_v18 = vpop.f32.mrb[8].mxu1 }
0x16cd   :  { %v1418_v19 = vadd.f32 %v1797_v35, %v1417_v18  ;;  %v1978_v2 = vpop.f32.mrb[9].mxu1 }
0x16cf   :  { %v1428_v3 = vrot.slane %v1418_v19, %v1427_v36 }
0x16d1   :  { %v1429_v4 = vcombine.high %v1428_v3, %v1428_v3  ;;  %v1436_v55 = vrot.slane %v1428_v3, %v1427_v36 }
0x16d3   :  { %v1447_v43 = vrot.slane %v1436_v55, %v1446_v54  ;;  %v1443_v44 = vrot.slane %v1429_v4, %v1427_v36 }
0x16d5   :  { %v1454_v14 = vmul.f32 %v1447_v43, %v1316_v47  ;;  %v1451_v11 = vrot.slane %v1443_v44, %v1446_v54 }
0x16d7   :  { %v1456_v12 = vsel %vm64_vm1, %v1454_v14, 0.0  ;;  %v1455_v13 = vmul.f32 %v1451_v11, %v1317_v46  ;;  %v18_v11 = vstv %s2656_s12 }
0x16d8   :  { %1457 = vadd.xlane.f32.xlu1 %v1456_v12  ;;  %19 = vst [vmem:[#allocation3] sm:$0x1] %v18_v11  ;;  %v1802_v12 = vld [vmem:[%s2657_s10] ss:$0 sm:$0xff] }
0x16d9   :  { %v1459_v15 = vsel %vm64_vm1, %v1455_v13, 0.0 }
0x16da   :  { %1460 = vadd.xlane.f32.xlu0 %v1459_v15 }
0x1765   :  { %v1458_v21 = vpop.xlane.xlu1 %1457 }
0x1766   :  { %v1469_v23 = vrot.slane %v1458_v21, %v1468_v20 }
0x1767   :  { %v1461_v22 = vpop.xlane.xlu0 %1460 }
0x1768   :  { %v1473_v26 = vrot.slane %v1461_v22, %v1468_v20 }
0x176a   :  { %v1474_v27 = vsel %vm291_vm2, %v1473_v26, %v1469_v23  ;;  %v1805_v26 = vld [vmem:[#allocation3] ss:$0 sm:$0xff] }
0x176b   :  { %v1477_v28 = vsel %vm1476_vm11, %v1474_v27, -inf }
0x176c   :  { %1478 = vmax.xlane.f32.xlu0 %v1477_v28 }
0x17f9   :  { %v1479_v31 = vpop.xlane.xlu0 %1478 }
0x17fa   :  { %v1484_v32 = vrot.slane %v1479_v31, %v1446_v54  ;;  %v1488_v33 = vrot.slane %v1479_v31, %v1487_v30 }
0x17fc   :  { %v1491_v34 = vsub.f32 %v1458_v21, %v1484_v32  ;;  %v1492_v37 = vsub.f32 %v1461_v22, %v1488_v33 }
0x17fe   :  { %v1493_v38 = vmul.f32 1.442695, %v1491_v34  ;;  %v1495_v39 = vmul.f32 1.442695, %v1492_v37 }
0x1800   :  { %2182 = vpow2.f32 %v1493_v38 }
0x1801   :  { %2184 = vpow2.f32 %v1495_v39 }
0x180a   :  { %v2183_v40 = vpop.eup %2182 }
0x180b   :  { %v2185_v41 = vpop.eup %2184  ;;  %1500 = vperm.xlu1 %2084, %v2183_v40  }
0x180c   :  { %1503 = vperm.xlu0 %2085, %v2185_v41  }
0x188a   :  { %v1501_v42 = vpop.permute.xlu1 %1500 }
0x188b   :  { %v1504_v45 = vpop.permute.xlu0 %1503  ;;  %v1508_v46 = vrot.slane %v1501_v42, %v1468_v20 }
0x188c   :  { %v1512_v47 = vrot.slane %v1504_v45, %v1468_v20  ;;  %v1804_v20 = vld [vmem:[%s2658_s11] ss:$0 sm:$0xff] }
0x188e   :  { %v1513_v48 = vsel %vm291_vm2, %v1512_v47, %v1508_v46 }
0x188f   :  { %v1515_v49 = vsel %vm1476_vm11, %v1513_v48, 0.0 }
0x1890   :  { %1516 = vadd.xlane.f32.xlu1 %v1515_v49 }
0x191d   :  { %v1517_v51 = vpop.xlane.xlu1 %1516 }
0x191e   :  { %v1522_v52 = vrot.slane %v1517_v51, %v1446_v54  ;;  %v1526_v53 = vrot.slane %v1517_v51, %v1487_v30 }
0x1920   :  { %2186 = vrcp.f32 %v1522_v52 }
0x1921   :  { %2188 = vrcp.f32 %v1526_v53 }
0x192a   :  { %v2187_v57 = vpop.eup %2186 }
0x192b   :  { %v1530_v58 = vmul.f32 %v2187_v57, %v2183_v40  ;;  %v2189_v59 = vpop.eup %2188 }
0x192c   :  { %v1532_v16 = vmul.f32 %v2189_v59, %v2185_v41 }
0x192d   :  { %1627 = vperm.xlu0 %2085, %v1530_v58  }
0x1931   :  { %1632 = vperm.xlu0 %2085, %v1532_v16  }
0x19ac   :  { %v1628_v10 = vpop.permute.xlu0 %1627 }
0x19ad   :  { %v1635_v24 = vmul.f32 %v1628_v10, %v1617_v9 }
0x19af   :  { %v1637_v25 = vsel %vm64_vm1, %v1635_v24, 0.0 }
0x19b0   :  { %v1638_v50 = vrot.slane %v1637_v25, 4  ;;  %v1633_v56 = vpop.permute.xlu0 %1632 }
0x19b1   :  { %v1636_v35 = vmul.f32 %v1633_v56, %v1622_v0 }
0x19b2   :  { %v1639_v36 = vadd.f32 %v1638_v50, %v1637_v25 }
0x19b3   :  { %v1644_v18 = vsel %vm64_vm1, %v1636_v35, 0.0 }
0x19b4   :  { %v1640_v19 = vrot.slane %v1639_v36, 2  ;;  %v1645_v2 = vrot.slane %v1644_v18, 4 }
0x19b6   :  { %v1641_v3 = vadd.f32 %v1640_v19, %v1639_v36  ;;  %v1646_v54 = vadd.f32 %v1645_v2, %v1644_v18 }
0x19b8   :  { %v1647_v4 = vrot.slane %v1646_v54, 2  ;;  %v1642_v55 = vrot.slane %v1641_v3, 1 }
0x19ba   :  { %v1648_v43 = vadd.f32 %v1647_v4, %v1646_v54  ;;  %v1643_v44 = vadd.f32 %v1642_v55, %v1641_v3 }
0x19bc   :  { %v1649_v8 = vrot.slane %v1648_v43, 1 }
0x19be   :  { %v1650_v14 = vadd.f32 %v1649_v8, %v1648_v43 }
0x19c0   :  { %v1664_v7 = vsel %vm291_vm2, %v1650_v14, %v1643_v44 }
0x19c1   :  { %1999 = vmatmul.mubr.msk.f32.vlgmr.msra.gmra.mrb[10].mxu1 %vm64_vm1, %v1664_v7 }
0x1a94   :  { %v1733_v13 = vpop.f32.mrb[10].mxu1 }
0x1a95   :  { %v1734_v15 = vadd.f32 %v1802_v12, %v1733_v13  ;;  %v2000_v17 = vpop.f32.mrb[11].mxu1 }
0x1a97   :  { %v1737_v21 = vmax.f32 %v1734_v15, 0.0 }
0x1a99   :  { %v1745_v22 = vmul.f32 %v1804_v20, %v1737_v21 }
0x1a9b   :  { %v1747_v23 = vsel %vm1746_vm12, %v1745_v22, 0.0 }
0x1a9c   :  { %1748 = vadd.xlane.f32.xlu1 %v1747_v23 }
0x1b29   :  { %v1749_v27 = vpop.xlane.xlu1 %1748 }
0x1b2a   :  { %v1757_v28 = vadd.f32 %v1805_v26, %v1749_v27 }
0x1b2c   :  { %v1806_v29 = vmul.f32 -1.442695, %v1757_v28 }
0x1b2e   :  { %2190 = vpow2.f32 %v1806_v29 }
0x1b38   :  { %v2191_v30 = vpop.eup %2190 }
0x1b39   :  { %v1761_v31 = vadd.f32 1.0, %v2191_v30 }
0x1b3b   :  { %2192 = vrcp.f32 %v1761_v31 }
0x1b45   :  { %v2193_v32 = vpop.eup %2192 }
0x1b46   :  { %1765 = vst.msk [vmem:[%s2659_s13] sm:$0x3] %vm1764_vm13, %v2193_v32 }

</bundles_post_ra>
